<compile_context>
chip_gen: v5e
topology: v5e:2x2
jax: 0.10.0
libtpu: 0.0.40
codegen_flags: <defaults>
</compile_context>

<pallas_src>
import functools

import jax
import jax.numpy as jnp
from jax.experimental import pallas as pl
from jax.experimental.pallas import tpu as pltpu


# -----------------------------------------------------------------------------
# Pallas kernel
# -----------------------------------------------------------------------------
def _lstm_model_kernel(x_ref, *refs, num_layers, seq_len, batch, hidden_size):
    """refs = [w_ih_T_0, w_hh_T_0, b_0, ..., w_ih_T_{L-1}, w_hh_T_{L-1}, b_{L-1},
               w_fc_T, b_fc, out_ref]

    x_ref: (T*B, D_in) float32, time-major (rows ordered (t, b))."""
    layer_refs = refs[: 3 * num_layers]
    w_fc_ref = refs[3 * num_layers]
    b_fc_ref = refs[3 * num_layers + 1]
    out_ref = refs[-1]

    T, B, H = seq_len, batch, hidden_size
    G = 4 * H

    # g-gate lane mask (lanes [2H, 3H) of the 4H-wide gate vector), hoisted once
    # out of the loops (JAX does not CSE broadcast_in_dim).
    lane = jax.lax.broadcasted_iota(jnp.int32, (B, G), 1)
    g_mask = (lane >= 2 * H) & (lane < 3 * H)

    seq = x_ref[...].astype(jnp.float32)                      # (T*B, D_in)

    h = jnp.zeros((B, H), jnp.float32)
    for l in range(num_layers):
        w_ih_T = layer_refs[3 * l + 0][...]                   # (D_l, 4H)
        w_hh_T = layer_refs[3 * l + 1][...]                   # (H,   4H)
        bias = layer_refs[3 * l + 2][...]                     # (1,   4H)

        # Input-side projection for the WHOLE sequence as one MXU-friendly
        # matmul; bias broadcast happens once here, not per time step.
        xp = jnp.dot(seq, w_ih_T, preferred_element_type=jnp.float32) + bias  # (T*B, 4H)

        h = jnp.zeros((B, H), jnp.float32)                    # h0 = 0
        c = jnp.zeros((B, H), jnp.float32)                    # c0 = 0
        outs = []
        for t in range(T):                                    # static unroll (T=8)
            # Single recurrent matmul on the serial chain.
            pre = xp[t * B:(t + 1) * B, :] + jnp.dot(
                h, w_hh_T, preferred_element_type=jnp.float32)        # (B, 4H)
            # Full-lane-width activations: 1 tanh + 1 sigmoid + 1 select instead
            # of 4 quarter-width sliced EUP calls. Numerically identical.
            act = jnp.where(g_mask, jnp.tanh(pre), jax.nn.sigmoid(pre))
            i_g = act[:, 0 * H:1 * H]
            f_g = act[:, 1 * H:2 * H]
            g_g = act[:, 2 * H:3 * H]
            o_g = act[:, 3 * H:4 * H]
            c = f_g * c + i_g * g_g
            h = o_g * jnp.tanh(c)
            if l < num_layers - 1:
                outs.append(h)
        if l < num_layers - 1:
            # Next layer's input sequence, time-major (t, b) ordering preserved.
            seq = jnp.concatenate(outs, axis=0)               # (T*B, H)
        # inter-layer / pre-fc dropout (p=0.1) is identity in eval mode

    # fc + softmax over classes (dim=1). `h` is the last layer's last-step state.
    logits = (
        jnp.dot(h, w_fc_ref[...], preferred_element_type=jnp.float32)
        + b_fc_ref[...]
    )                                                         # (B, C)
    logits = logits - jnp.max(logits, axis=1, keepdims=True)
    e = jnp.exp(logits)
    probs = e * pl.reciprocal(jnp.sum(e, axis=1, keepdims=True), approx=True)
    out_ref[...] = probs.astype(out_ref.dtype)


# -----------------------------------------------------------------------------
# Wrapper
# -----------------------------------------------------------------------------
def lstm_model_forward(x, params, *, hidden_size, num_layers, num_classes):
    """x: (B, T, D_in) float32; params: dict of per-layer LSTM + fc weights."""
    B, T, D = x.shape
    B_pad = ((B + 7) // 8) * 8                                # fill 8 sublanes / MXU rows

    # Zero-pad batch (recurrence is row-independent; padded rows sliced off) and
    # go time-major so each time step is a contiguous B_pad-row block.
    x_p = jnp.pad(x.astype(jnp.float32), ((0, B_pad - B), (0, 0), (0, 0)))
    x_tm = jnp.transpose(x_p, (1, 0, 2)).reshape(T * B_pad, D)

    flat = []
    for l in range(num_layers):
        flat.append(jnp.transpose(params[f"w_ih_{l}"]).astype(jnp.float32))   # (D_l, 4H)
        flat.append(jnp.transpose(params[f"w_hh_{l}"]).astype(jnp.float32))   # (H, 4H)
        b = (params[f"b_ih_{l}"] + params[f"b_hh_{l}"]).reshape(1, -1)        # (1, 4H)
        flat.append(b.astype(jnp.float32))
    flat.append(jnp.transpose(params["w_fc"]).astype(jnp.float32))            # (H, C)
    flat.append(params["b_fc"].reshape(1, -1).astype(jnp.float32))            # (1, C)

    kernel = functools.partial(
        _lstm_model_kernel,
        num_layers=num_layers,
        seq_len=T,
        batch=B_pad,
        hidden_size=hidden_size,
    )
    n_in = 1 + len(flat)
    out = pl.pallas_call(
        kernel,
        out_shape=jax.ShapeDtypeStruct((B_pad, num_classes), jnp.float32),
        in_specs=[pl.BlockSpec(memory_space=pltpu.MemorySpace.VMEM)] * n_in,
        out_specs=pl.BlockSpec(memory_space=pltpu.MemorySpace.VMEM),
    )(x_tm, *flat)
    return out[:B]


# -----------------------------------------------------------------------------
# Pure-JAX reference (exact math) for a sanity check
# -----------------------------------------------------------------------------
def _reference(x, params, *, hidden_size, num_layers):
    B, T, _ = x.shape
    H = hidden_size
    hs = [jnp.zeros((B, H), jnp.float32) for _ in range(num_layers)]
    cs = [jnp.zeros((B, H), jnp.float32) for _ in range(num_layers)]
    for t in range(T):
        inp = x[:, t, :]
        for l in range(num_layers):
            gates = (inp @ params[f"w_ih_{l}"].T + hs[l] @ params[f"w_hh_{l}"].T
                     + params[f"b_ih_{l}"] + params[f"b_hh_{l}"])
            i_g = jax.nn.sigmoid(gates[:, 0 * H:1 * H])
            f_g = jax.nn.sigmoid(gates[:, 1 * H:2 * H])
            g_g = jnp.tanh(gates[:, 2 * H:3 * H])
            o_g = jax.nn.sigmoid(gates[:, 3 * H:4 * H])
            cs[l] = f_g * cs[l] + i_g * g_g
            hs[l] = o_g * jnp.tanh(cs[l])
            inp = hs[l]
    logits = hs[-1] @ params["w_fc"].T + params["b_fc"]
    return jax.nn.softmax(logits, axis=1)


# -----------------------------------------------------------------------------
# Main
# -----------------------------------------------------------------------------
if __name__ == "__main__":
    B, T = 2, 8               # batch, sequence length
    INPUT_SIZE = 16
    HIDDEN_SIZE = 32
    NUM_LAYERS = 2
    NUM_CLASSES = 5

    key = jax.random.PRNGKey(0)
    keys = iter(jax.random.split(key, 4 * NUM_LAYERS + 4))
    scale = 1.0 / jnp.sqrt(HIDDEN_SIZE)

    params = {}
    for l in range(NUM_LAYERS):
        d_in = INPUT_SIZE if l == 0 else HIDDEN_SIZE
        params[f"w_ih_{l}"] = jax.random.uniform(
            next(keys), (4 * HIDDEN_SIZE, d_in), jnp.float32, -scale, scale)
        params[f"w_hh_{l}"] = jax.random.uniform(
            next(keys), (4 * HIDDEN_SIZE, HIDDEN_SIZE), jnp.float32, -scale, scale)
        params[f"b_ih_{l}"] = jax.random.uniform(
            next(keys), (4 * HIDDEN_SIZE,), jnp.float32, -scale, scale)
        params[f"b_hh_{l}"] = jax.random.uniform(
            next(keys), (4 * HIDDEN_SIZE,), jnp.float32, -scale, scale)
    params["w_fc"] = jax.random.uniform(
        next(keys), (NUM_CLASSES, HIDDEN_SIZE), jnp.float32, -scale, scale)
    params["b_fc"] = jax.random.uniform(
        next(keys), (NUM_CLASSES,), jnp.float32, -scale, scale)

    x = jax.random.normal(next(keys), (B, T, INPUT_SIZE), jnp.float32)

    out = lstm_model_forward(
        x, params,
        hidden_size=HIDDEN_SIZE, num_layers=NUM_LAYERS, num_classes=NUM_CLASSES)
    out = jax.block_until_ready(out)

    ref = _reference(x, params, hidden_size=HIDDEN_SIZE, num_layers=NUM_LAYERS)
    assert out.shape == (B, NUM_CLASSES)
    # Tolerance relaxed vs the exact reference because the softmax denominator
    # uses the EUP approximate reciprocal (per review); gate math is exact f32.
    assert jnp.allclose(out, ref, atol=2e-3, rtol=2e-3), "mismatch vs JAX reference"
    assert jnp.allclose(jnp.sum(out, axis=1), 1.0, atol=2e-3), "softmax rows must sum to ~1"

    print("KERNEL_OK")
</pallas_src>

<mosaic_0001>
module attributes {stable_mosaic.version = 11 : i64} {
  func.func @_lstm_model_kernel(%arg0: memref<64x16xf32, #tpu.memory_space<vmem>>, %arg1: memref<16x128xf32, #tpu.memory_space<vmem>>, %arg2: memref<32x128xf32, #tpu.memory_space<vmem>>, %arg3: memref<1x128xf32, #tpu.memory_space<vmem>>, %arg4: memref<32x128xf32, #tpu.memory_space<vmem>>, %arg5: memref<32x128xf32, #tpu.memory_space<vmem>>, %arg6: memref<1x128xf32, #tpu.memory_space<vmem>>, %arg7: memref<32x5xf32, #tpu.memory_space<vmem>>, %arg8: memref<1x5xf32, #tpu.memory_space<vmem>>, %arg9: memref<8x5xf32, #tpu.memory_space<vmem>>) attributes {dimension_semantics = [], scalar_prefetch = 0 : i64, scratch_operands = 0 : i64, tpu.core_type = #tpu.core_type<tc>} {
    %0 = tpu.iota {dimensions = array<i32: 1>} : vector<8x128xi32>
    %c64_i32 = arith.constant 64 : i32
    %1 = vector.broadcast %c64_i32 : i32 to vector<8x128xi32>
    %2 = arith.cmpi sge, %0, %1 : vector<8x128xi32>
    %c96_i32 = arith.constant 96 : i32
    %3 = vector.broadcast %c96_i32 : i32 to vector<8x128xi32>
    %4 = arith.cmpi slt, %0, %3 : vector<8x128xi32>
    %5 = arith.andi %2, %4 : vector<8x128xi1>
    %c0 = arith.constant 0 : index
    %c0_0 = arith.constant 0 : index
    %6 = vector.load %arg0[%c0, %c0_0] : memref<64x16xf32, #tpu.memory_space<vmem>>, vector<64x16xf32>
    %c0_1 = arith.constant 0 : index
    %c0_2 = arith.constant 0 : index
    %7 = vector.load %arg1[%c0_1, %c0_2] : memref<16x128xf32, #tpu.memory_space<vmem>>, vector<16x128xf32>
    %c0_3 = arith.constant 0 : index
    %c0_4 = arith.constant 0 : index
    %8 = vector.load %arg2[%c0_3, %c0_4] : memref<32x128xf32, #tpu.memory_space<vmem>>, vector<32x128xf32>
    %c0_5 = arith.constant 0 : index
    %c0_6 = arith.constant 0 : index
    %9 = vector.load %arg3[%c0_5, %c0_6] : memref<1x128xf32, #tpu.memory_space<vmem>>, vector<1x128xf32>
    %cst = arith.constant dense<0.000000e+00> : vector<64x128xf32>
    %10 = tpu.matmul %6, %7, %cst {dimension_numbers = #tpu.dot_dimension_numbers<[1], [0], [0], [1], [0, 0, 1, 1], [], []>} : vector<64x16xf32>, vector<16x128xf32>, vector<64x128xf32> -> vector<64x128xf32>
    %11 = vector.broadcast %9 : vector<1x128xf32> to vector<64x128xf32>
    %12 = arith.addf %10, %11 : vector<64x128xf32>
    %cst_7 = arith.constant 0.000000e+00 : f32
    %13 = vector.broadcast %cst_7 : f32 to vector<8x32xf32>
    %cst_8 = arith.constant 0.000000e+00 : f32
    %14 = vector.broadcast %cst_8 : f32 to vector<8x32xf32>
    %15 = vector.extract_strided_slice %12 {offsets = [0, 0], sizes = [8, 128], strides = [1, 1]} : vector<64x128xf32> to vector<8x128xf32>
    %cst_9 = arith.constant dense<0.000000e+00> : vector<8x128xf32>
    %16 = tpu.matmul %13, %8, %cst_9 {dimension_numbers = #tpu.dot_dimension_numbers<[1], [0], [0], [1], [0, 0, 1, 1], [], []>} : vector<8x32xf32>, vector<32x128xf32>, vector<8x128xf32> -> vector<8x128xf32>
    %17 = arith.addf %15, %16 : vector<8x128xf32>
    %18 = math.tanh %17 : vector<8x128xf32>
    %19 = arith.negf %17 : vector<8x128xf32>
    %20 = math.exp %19 : vector<8x128xf32>
    %cst_10 = arith.constant 1.000000e+00 : f32
    %21 = vector.broadcast %cst_10 : f32 to vector<8x128xf32>
    %22 = arith.addf %21, %20 : vector<8x128xf32>
    %23 = arith.divf %21, %22 : vector<8x128xf32>
    %24 = arith.select %5, %18, %23 : vector<8x128xi1>, vector<8x128xf32>
    %25 = vector.extract_strided_slice %24 {offsets = [0, 0], sizes = [8, 32], strides = [1, 1]} : vector<8x128xf32> to vector<8x32xf32>
    %26 = vector.extract_strided_slice %24 {offsets = [0, 32], sizes = [8, 32], strides = [1, 1]} : vector<8x128xf32> to vector<8x32xf32>
    %27 = vector.extract_strided_slice %24 {offsets = [0, 64], sizes = [8, 32], strides = [1, 1]} : vector<8x128xf32> to vector<8x32xf32>
    %28 = vector.extract_strided_slice %24 {offsets = [0, 96], sizes = [8, 32], strides = [1, 1]} : vector<8x128xf32> to vector<8x32xf32>
    %29 = arith.mulf %26, %14 : vector<8x32xf32>
    %30 = arith.mulf %25, %27 : vector<8x32xf32>
    %31 = arith.addf %29, %30 : vector<8x32xf32>
    %32 = math.tanh %31 : vector<8x32xf32>
    %33 = arith.mulf %28, %32 : vector<8x32xf32>
    %34 = vector.extract_strided_slice %12 {offsets = [8, 0], sizes = [8, 128], strides = [1, 1]} : vector<64x128xf32> to vector<8x128xf32>
    %cst_11 = arith.constant dense<0.000000e+00> : vector<8x128xf32>
    %35 = tpu.matmul %33, %8, %cst_11 {dimension_numbers = #tpu.dot_dimension_numbers<[1], [0], [0], [1], [0, 0, 1, 1], [], []>} : vector<8x32xf32>, vector<32x128xf32>, vector<8x128xf32> -> vector<8x128xf32>
    %36 = arith.addf %34, %35 : vector<8x128xf32>
    %37 = math.tanh %36 : vector<8x128xf32>
    %38 = arith.negf %36 : vector<8x128xf32>
    %39 = math.exp %38 : vector<8x128xf32>
    %cst_12 = arith.constant 1.000000e+00 : f32
    %40 = vector.broadcast %cst_12 : f32 to vector<8x128xf32>
    %41 = arith.addf %40, %39 : vector<8x128xf32>
    %42 = arith.divf %40, %41 : vector<8x128xf32>
    %43 = arith.select %5, %37, %42 : vector<8x128xi1>, vector<8x128xf32>
    %44 = vector.extract_strided_slice %43 {offsets = [0, 0], sizes = [8, 32], strides = [1, 1]} : vector<8x128xf32> to vector<8x32xf32>
    %45 = vector.extract_strided_slice %43 {offsets = [0, 32], sizes = [8, 32], strides = [1, 1]} : vector<8x128xf32> to vector<8x32xf32>
    %46 = vector.extract_strided_slice %43 {offsets = [0, 64], sizes = [8, 32], strides = [1, 1]} : vector<8x128xf32> to vector<8x32xf32>
    %47 = vector.extract_strided_slice %43 {offsets = [0, 96], sizes = [8, 32], strides = [1, 1]} : vector<8x128xf32> to vector<8x32xf32>
    %48 = arith.mulf %45, %31 : vector<8x32xf32>
    %49 = arith.mulf %44, %46 : vector<8x32xf32>
    %50 = arith.addf %48, %49 : vector<8x32xf32>
    %51 = math.tanh %50 : vector<8x32xf32>
    %52 = arith.mulf %47, %51 : vector<8x32xf32>
    %53 = vector.extract_strided_slice %12 {offsets = [16, 0], sizes = [8, 128], strides = [1, 1]} : vector<64x128xf32> to vector<8x128xf32>
    %cst_13 = arith.constant dense<0.000000e+00> : vector<8x128xf32>
    %54 = tpu.matmul %52, %8, %cst_13 {dimension_numbers = #tpu.dot_dimension_numbers<[1], [0], [0], [1], [0, 0, 1, 1], [], []>} : vector<8x32xf32>, vector<32x128xf32>, vector<8x128xf32> -> vector<8x128xf32>
    %55 = arith.addf %53, %54 : vector<8x128xf32>
    %56 = math.tanh %55 : vector<8x128xf32>
    %57 = arith.negf %55 : vector<8x128xf32>
    %58 = math.exp %57 : vector<8x128xf32>
    %cst_14 = arith.constant 1.000000e+00 : f32
    %59 = vector.broadcast %cst_14 : f32 to vector<8x128xf32>
    %60 = arith.addf %59, %58 : vector<8x128xf32>
    %61 = arith.divf %59, %60 : vector<8x128xf32>
    %62 = arith.select %5, %56, %61 : vector<8x128xi1>, vector<8x128xf32>
    %63 = vector.extract_strided_slice %62 {offsets = [0, 0], sizes = [8, 32], strides = [1, 1]} : vector<8x128xf32> to vector<8x32xf32>
    %64 = vector.extract_strided_slice %62 {offsets = [0, 32], sizes = [8, 32], strides = [1, 1]} : vector<8x128xf32> to vector<8x32xf32>
    %65 = vector.extract_strided_slice %62 {offsets = [0, 64], sizes = [8, 32], strides = [1, 1]} : vector<8x128xf32> to vector<8x32xf32>
    %66 = vector.extract_strided_slice %62 {offsets = [0, 96], sizes = [8, 32], strides = [1, 1]} : vector<8x128xf32> to vector<8x32xf32>
    %67 = arith.mulf %64, %50 : vector<8x32xf32>
    %68 = arith.mulf %63, %65 : vector<8x32xf32>
    %69 = arith.addf %67, %68 : vector<8x32xf32>
    %70 = math.tanh %69 : vector<8x32xf32>
    %71 = arith.mulf %66, %70 : vector<8x32xf32>
    %72 = vector.extract_strided_slice %12 {offsets = [24, 0], sizes = [8, 128], strides = [1, 1]} : vector<64x128xf32> to vector<8x128xf32>
    %cst_15 = arith.constant dense<0.000000e+00> : vector<8x128xf32>
    %73 = tpu.matmul %71, %8, %cst_15 {dimension_numbers = #tpu.dot_dimension_numbers<[1], [0], [0], [1], [0, 0, 1, 1], [], []>} : vector<8x32xf32>, vector<32x128xf32>, vector<8x128xf32> -> vector<8x128xf32>
    %74 = arith.addf %72, %73 : vector<8x128xf32>
    %75 = math.tanh %74 : vector<8x128xf32>
    %76 = arith.negf %74 : vector<8x128xf32>
    %77 = math.exp %76 : vector<8x128xf32>
    %cst_16 = arith.constant 1.000000e+00 : f32
    %78 = vector.broadcast %cst_16 : f32 to vector<8x128xf32>
    %79 = arith.addf %78, %77 : vector<8x128xf32>
    %80 = arith.divf %78, %79 : vector<8x128xf32>
    %81 = arith.select %5, %75, %80 : vector<8x128xi1>, vector<8x128xf32>
    %82 = vector.extract_strided_slice %81 {offsets = [0, 0], sizes = [8, 32], strides = [1, 1]} : vector<8x128xf32> to vector<8x32xf32>
    %83 = vector.extract_strided_slice %81 {offsets = [0, 32], sizes = [8, 32], strides = [1, 1]} : vector<8x128xf32> to vector<8x32xf32>
    %84 = vector.extract_strided_slice %81 {offsets = [0, 64], sizes = [8, 32], strides = [1, 1]} : vector<8x128xf32> to vector<8x32xf32>
    %85 = vector.extract_strided_slice %81 {offsets = [0, 96], sizes = [8, 32], strides = [1, 1]} : vector<8x128xf32> to vector<8x32xf32>
    %86 = arith.mulf %83, %69 : vector<8x32xf32>
    %87 = arith.mulf %82, %84 : vector<8x32xf32>
    %88 = arith.addf %86, %87 : vector<8x32xf32>
    %89 = math.tanh %88 : vector<8x32xf32>
    %90 = arith.mulf %85, %89 : vector<8x32xf32>
    %91 = vector.extract_strided_slice %12 {offsets = [32, 0], sizes = [8, 128], strides = [1, 1]} : vector<64x128xf32> to vector<8x128xf32>
    %cst_17 = arith.constant dense<0.000000e+00> : vector<8x128xf32>
    %92 = tpu.matmul %90, %8, %cst_17 {dimension_numbers = #tpu.dot_dimension_numbers<[1], [0], [0], [1], [0, 0, 1, 1], [], []>} : vector<8x32xf32>, vector<32x128xf32>, vector<8x128xf32> -> vector<8x128xf32>
    %93 = arith.addf %91, %92 : vector<8x128xf32>
    %94 = math.tanh %93 : vector<8x128xf32>
    %95 = arith.negf %93 : vector<8x128xf32>
    %96 = math.exp %95 : vector<8x128xf32>
    %cst_18 = arith.constant 1.000000e+00 : f32
    %97 = vector.broadcast %cst_18 : f32 to vector<8x128xf32>
    %98 = arith.addf %97, %96 : vector<8x128xf32>
    %99 = arith.divf %97, %98 : vector<8x128xf32>
    %100 = arith.select %5, %94, %99 : vector<8x128xi1>, vector<8x128xf32>
    %101 = vector.extract_strided_slice %100 {offsets = [0, 0], sizes = [8, 32], strides = [1, 1]} : vector<8x128xf32> to vector<8x32xf32>
    %102 = vector.extract_strided_slice %100 {offsets = [0, 32], sizes = [8, 32], strides = [1, 1]} : vector<8x128xf32> to vector<8x32xf32>
    %103 = vector.extract_strided_slice %100 {offsets = [0, 64], sizes = [8, 32], strides = [1, 1]} : vector<8x128xf32> to vector<8x32xf32>
    %104 = vector.extract_strided_slice %100 {offsets = [0, 96], sizes = [8, 32], strides = [1, 1]} : vector<8x128xf32> to vector<8x32xf32>
    %105 = arith.mulf %102, %88 : vector<8x32xf32>
    %106 = arith.mulf %101, %103 : vector<8x32xf32>
    %107 = arith.addf %105, %106 : vector<8x32xf32>
    %108 = math.tanh %107 : vector<8x32xf32>
    %109 = arith.mulf %104, %108 : vector<8x32xf32>
    %110 = vector.extract_strided_slice %12 {offsets = [40, 0], sizes = [8, 128], strides = [1, 1]} : vector<64x128xf32> to vector<8x128xf32>
    %cst_19 = arith.constant dense<0.000000e+00> : vector<8x128xf32>
    %111 = tpu.matmul %109, %8, %cst_19 {dimension_numbers = #tpu.dot_dimension_numbers<[1], [0], [0], [1], [0, 0, 1, 1], [], []>} : vector<8x32xf32>, vector<32x128xf32>, vector<8x128xf32> -> vector<8x128xf32>
    %112 = arith.addf %110, %111 : vector<8x128xf32>
    %113 = math.tanh %112 : vector<8x128xf32>
    %114 = arith.negf %112 : vector<8x128xf32>
    %115 = math.exp %114 : vector<8x128xf32>
    %cst_20 = arith.constant 1.000000e+00 : f32
    %116 = vector.broadcast %cst_20 : f32 to vector<8x128xf32>
    %117 = arith.addf %116, %115 : vector<8x128xf32>
    %118 = arith.divf %116, %117 : vector<8x128xf32>
    %119 = arith.select %5, %113, %118 : vector<8x128xi1>, vector<8x128xf32>
    %120 = vector.extract_strided_slice %119 {offsets = [0, 0], sizes = [8, 32], strides = [1, 1]} : vector<8x128xf32> to vector<8x32xf32>
    %121 = vector.extract_strided_slice %119 {offsets = [0, 32], sizes = [8, 32], strides = [1, 1]} : vector<8x128xf32> to vector<8x32xf32>
    %122 = vector.extract_strided_slice %119 {offsets = [0, 64], sizes = [8, 32], strides = [1, 1]} : vector<8x128xf32> to vector<8x32xf32>
    %123 = vector.extract_strided_slice %119 {offsets = [0, 96], sizes = [8, 32], strides = [1, 1]} : vector<8x128xf32> to vector<8x32xf32>
    %124 = arith.mulf %121, %107 : vector<8x32xf32>
    %125 = arith.mulf %120, %122 : vector<8x32xf32>
    %126 = arith.addf %124, %125 : vector<8x32xf32>
    %127 = math.tanh %126 : vector<8x32xf32>
    %128 = arith.mulf %123, %127 : vector<8x32xf32>
    %129 = vector.extract_strided_slice %12 {offsets = [48, 0], sizes = [8, 128], strides = [1, 1]} : vector<64x128xf32> to vector<8x128xf32>
    %cst_21 = arith.constant dense<0.000000e+00> : vector<8x128xf32>
    %130 = tpu.matmul %128, %8, %cst_21 {dimension_numbers = #tpu.dot_dimension_numbers<[1], [0], [0], [1], [0, 0, 1, 1], [], []>} : vector<8x32xf32>, vector<32x128xf32>, vector<8x128xf32> -> vector<8x128xf32>
    %131 = arith.addf %129, %130 : vector<8x128xf32>
    %132 = math.tanh %131 : vector<8x128xf32>
    %133 = arith.negf %131 : vector<8x128xf32>
    %134 = math.exp %133 : vector<8x128xf32>
    %cst_22 = arith.constant 1.000000e+00 : f32
    %135 = vector.broadcast %cst_22 : f32 to vector<8x128xf32>
    %136 = arith.addf %135, %134 : vector<8x128xf32>
    %137 = arith.divf %135, %136 : vector<8x128xf32>
    %138 = arith.select %5, %132, %137 : vector<8x128xi1>, vector<8x128xf32>
    %139 = vector.extract_strided_slice %138 {offsets = [0, 0], sizes = [8, 32], strides = [1, 1]} : vector<8x128xf32> to vector<8x32xf32>
    %140 = vector.extract_strided_slice %138 {offsets = [0, 32], sizes = [8, 32], strides = [1, 1]} : vector<8x128xf32> to vector<8x32xf32>
    %141 = vector.extract_strided_slice %138 {offsets = [0, 64], sizes = [8, 32], strides = [1, 1]} : vector<8x128xf32> to vector<8x32xf32>
    %142 = vector.extract_strided_slice %138 {offsets = [0, 96], sizes = [8, 32], strides = [1, 1]} : vector<8x128xf32> to vector<8x32xf32>
    %143 = arith.mulf %140, %126 : vector<8x32xf32>
    %144 = arith.mulf %139, %141 : vector<8x32xf32>
    %145 = arith.addf %143, %144 : vector<8x32xf32>
    %146 = math.tanh %145 : vector<8x32xf32>
    %147 = arith.mulf %142, %146 : vector<8x32xf32>
    %148 = vector.extract_strided_slice %12 {offsets = [56, 0], sizes = [8, 128], strides = [1, 1]} : vector<64x128xf32> to vector<8x128xf32>
    %cst_23 = arith.constant dense<0.000000e+00> : vector<8x128xf32>
    %149 = tpu.matmul %147, %8, %cst_23 {dimension_numbers = #tpu.dot_dimension_numbers<[1], [0], [0], [1], [0, 0, 1, 1], [], []>} : vector<8x32xf32>, vector<32x128xf32>, vector<8x128xf32> -> vector<8x128xf32>
    %150 = arith.addf %148, %149 : vector<8x128xf32>
    %151 = math.tanh %150 : vector<8x128xf32>
    %152 = arith.negf %150 : vector<8x128xf32>
    %153 = math.exp %152 : vector<8x128xf32>
    %cst_24 = arith.constant 1.000000e+00 : f32
    %154 = vector.broadcast %cst_24 : f32 to vector<8x128xf32>
    %155 = arith.addf %154, %153 : vector<8x128xf32>
    %156 = arith.divf %154, %155 : vector<8x128xf32>
    %157 = arith.select %5, %151, %156 : vector<8x128xi1>, vector<8x128xf32>
    %158 = vector.extract_strided_slice %157 {offsets = [0, 0], sizes = [8, 32], strides = [1, 1]} : vector<8x128xf32> to vector<8x32xf32>
    %159 = vector.extract_strided_slice %157 {offsets = [0, 32], sizes = [8, 32], strides = [1, 1]} : vector<8x128xf32> to vector<8x32xf32>
    %160 = vector.extract_strided_slice %157 {offsets = [0, 64], sizes = [8, 32], strides = [1, 1]} : vector<8x128xf32> to vector<8x32xf32>
    %161 = vector.extract_strided_slice %157 {offsets = [0, 96], sizes = [8, 32], strides = [1, 1]} : vector<8x128xf32> to vector<8x32xf32>
    %162 = arith.mulf %159, %145 : vector<8x32xf32>
    %163 = arith.mulf %158, %160 : vector<8x32xf32>
    %164 = arith.addf %162, %163 : vector<8x32xf32>
    %165 = math.tanh %164 : vector<8x32xf32>
    %166 = arith.mulf %161, %165 : vector<8x32xf32>
    %167 = tpu.concatenate %33, %52, %71, %90, %109, %128, %147, %166 in 0 : vector<8x32xf32>, vector<8x32xf32>, vector<8x32xf32>, vector<8x32xf32>, vector<8x32xf32>, vector<8x32xf32>, vector<8x32xf32>, vector<8x32xf32> -> vector<64x32xf32>
    %c0_25 = arith.constant 0 : index
    %c0_26 = arith.constant 0 : index
    %168 = vector.load %arg4[%c0_25, %c0_26] : memref<32x128xf32, #tpu.memory_space<vmem>>, vector<32x128xf32>
    %c0_27 = arith.constant 0 : index
    %c0_28 = arith.constant 0 : index
    %169 = vector.load %arg5[%c0_27, %c0_28] : memref<32x128xf32, #tpu.memory_space<vmem>>, vector<32x128xf32>
    %c0_29 = arith.constant 0 : index
    %c0_30 = arith.constant 0 : index
    %170 = vector.load %arg6[%c0_29, %c0_30] : memref<1x128xf32, #tpu.memory_space<vmem>>, vector<1x128xf32>
    %cst_31 = arith.constant dense<0.000000e+00> : vector<64x128xf32>
    %171 = tpu.matmul %167, %168, %cst_31 {dimension_numbers = #tpu.dot_dimension_numbers<[1], [0], [0], [1], [0, 0, 1, 1], [], []>} : vector<64x32xf32>, vector<32x128xf32>, vector<64x128xf32> -> vector<64x128xf32>
    %172 = vector.broadcast %170 : vector<1x128xf32> to vector<64x128xf32>
    %173 = arith.addf %171, %172 : vector<64x128xf32>
    %cst_32 = arith.constant 0.000000e+00 : f32
    %174 = vector.broadcast %cst_32 : f32 to vector<8x32xf32>
    %cst_33 = arith.constant 0.000000e+00 : f32
    %175 = vector.broadcast %cst_33 : f32 to vector<8x32xf32>
    %176 = vector.extract_strided_slice %173 {offsets = [0, 0], sizes = [8, 128], strides = [1, 1]} : vector<64x128xf32> to vector<8x128xf32>
    %cst_34 = arith.constant dense<0.000000e+00> : vector<8x128xf32>
    %177 = tpu.matmul %174, %169, %cst_34 {dimension_numbers = #tpu.dot_dimension_numbers<[1], [0], [0], [1], [0, 0, 1, 1], [], []>} : vector<8x32xf32>, vector<32x128xf32>, vector<8x128xf32> -> vector<8x128xf32>
    %178 = arith.addf %176, %177 : vector<8x128xf32>
    %179 = math.tanh %178 : vector<8x128xf32>
    %180 = arith.negf %178 : vector<8x128xf32>
    %181 = math.exp %180 : vector<8x128xf32>
    %cst_35 = arith.constant 1.000000e+00 : f32
    %182 = vector.broadcast %cst_35 : f32 to vector<8x128xf32>
    %183 = arith.addf %182, %181 : vector<8x128xf32>
    %184 = arith.divf %182, %183 : vector<8x128xf32>
    %185 = arith.select %5, %179, %184 : vector<8x128xi1>, vector<8x128xf32>
    %186 = vector.extract_strided_slice %185 {offsets = [0, 0], sizes = [8, 32], strides = [1, 1]} : vector<8x128xf32> to vector<8x32xf32>
    %187 = vector.extract_strided_slice %185 {offsets = [0, 32], sizes = [8, 32], strides = [1, 1]} : vector<8x128xf32> to vector<8x32xf32>
    %188 = vector.extract_strided_slice %185 {offsets = [0, 64], sizes = [8, 32], strides = [1, 1]} : vector<8x128xf32> to vector<8x32xf32>
    %189 = vector.extract_strided_slice %185 {offsets = [0, 96], sizes = [8, 32], strides = [1, 1]} : vector<8x128xf32> to vector<8x32xf32>
    %190 = arith.mulf %187, %175 : vector<8x32xf32>
    %191 = arith.mulf %186, %188 : vector<8x32xf32>
    %192 = arith.addf %190, %191 : vector<8x32xf32>
    %193 = math.tanh %192 : vector<8x32xf32>
    %194 = arith.mulf %189, %193 : vector<8x32xf32>
    %195 = vector.extract_strided_slice %173 {offsets = [8, 0], sizes = [8, 128], strides = [1, 1]} : vector<64x128xf32> to vector<8x128xf32>
    %cst_36 = arith.constant dense<0.000000e+00> : vector<8x128xf32>
    %196 = tpu.matmul %194, %169, %cst_36 {dimension_numbers = #tpu.dot_dimension_numbers<[1], [0], [0], [1], [0, 0, 1, 1], [], []>} : vector<8x32xf32>, vector<32x128xf32>, vector<8x128xf32> -> vector<8x128xf32>
    %197 = arith.addf %195, %196 : vector<8x128xf32>
    %198 = math.tanh %197 : vector<8x128xf32>
    %199 = arith.negf %197 : vector<8x128xf32>
    %200 = math.exp %199 : vector<8x128xf32>
    %cst_37 = arith.constant 1.000000e+00 : f32
    %201 = vector.broadcast %cst_37 : f32 to vector<8x128xf32>
    %202 = arith.addf %201, %200 : vector<8x128xf32>
    %203 = arith.divf %201, %202 : vector<8x128xf32>
    %204 = arith.select %5, %198, %203 : vector<8x128xi1>, vector<8x128xf32>
    %205 = vector.extract_strided_slice %204 {offsets = [0, 0], sizes = [8, 32], strides = [1, 1]} : vector<8x128xf32> to vector<8x32xf32>
    %206 = vector.extract_strided_slice %204 {offsets = [0, 32], sizes = [8, 32], strides = [1, 1]} : vector<8x128xf32> to vector<8x32xf32>
    %207 = vector.extract_strided_slice %204 {offsets = [0, 64], sizes = [8, 32], strides = [1, 1]} : vector<8x128xf32> to vector<8x32xf32>
    %208 = vector.extract_strided_slice %204 {offsets = [0, 96], sizes = [8, 32], strides = [1, 1]} : vector<8x128xf32> to vector<8x32xf32>
    %209 = arith.mulf %206, %192 : vector<8x32xf32>
    %210 = arith.mulf %205, %207 : vector<8x32xf32>
    %211 = arith.addf %209, %210 : vector<8x32xf32>
    %212 = math.tanh %211 : vector<8x32xf32>
    %213 = arith.mulf %208, %212 : vector<8x32xf32>
    %214 = vector.extract_strided_slice %173 {offsets = [16, 0], sizes = [8, 128], strides = [1, 1]} : vector<64x128xf32> to vector<8x128xf32>
    %cst_38 = arith.constant dense<0.000000e+00> : vector<8x128xf32>
    %215 = tpu.matmul %213, %169, %cst_38 {dimension_numbers = #tpu.dot_dimension_numbers<[1], [0], [0], [1], [0, 0, 1, 1], [], []>} : vector<8x32xf32>, vector<32x128xf32>, vector<8x128xf32> -> vector<8x128xf32>
    %216 = arith.addf %214, %215 : vector<8x128xf32>
    %217 = math.tanh %216 : vector<8x128xf32>
    %218 = arith.negf %216 : vector<8x128xf32>
    %219 = math.exp %218 : vector<8x128xf32>
    %cst_39 = arith.constant 1.000000e+00 : f32
    %220 = vector.broadcast %cst_39 : f32 to vector<8x128xf32>
    %221 = arith.addf %220, %219 : vector<8x128xf32>
    %222 = arith.divf %220, %221 : vector<8x128xf32>
    %223 = arith.select %5, %217, %222 : vector<8x128xi1>, vector<8x128xf32>
    %224 = vector.extract_strided_slice %223 {offsets = [0, 0], sizes = [8, 32], strides = [1, 1]} : vector<8x128xf32> to vector<8x32xf32>
    %225 = vector.extract_strided_slice %223 {offsets = [0, 32], sizes = [8, 32], strides = [1, 1]} : vector<8x128xf32> to vector<8x32xf32>
    %226 = vector.extract_strided_slice %223 {offsets = [0, 64], sizes = [8, 32], strides = [1, 1]} : vector<8x128xf32> to vector<8x32xf32>
    %227 = vector.extract_strided_slice %223 {offsets = [0, 96], sizes = [8, 32], strides = [1, 1]} : vector<8x128xf32> to vector<8x32xf32>
    %228 = arith.mulf %225, %211 : vector<8x32xf32>
    %229 = arith.mulf %224, %226 : vector<8x32xf32>
    %230 = arith.addf %228, %229 : vector<8x32xf32>
    %231 = math.tanh %230 : vector<8x32xf32>
    %232 = arith.mulf %227, %231 : vector<8x32xf32>
    %233 = vector.extract_strided_slice %173 {offsets = [24, 0], sizes = [8, 128], strides = [1, 1]} : vector<64x128xf32> to vector<8x128xf32>
    %cst_40 = arith.constant dense<0.000000e+00> : vector<8x128xf32>
    %234 = tpu.matmul %232, %169, %cst_40 {dimension_numbers = #tpu.dot_dimension_numbers<[1], [0], [0], [1], [0, 0, 1, 1], [], []>} : vector<8x32xf32>, vector<32x128xf32>, vector<8x128xf32> -> vector<8x128xf32>
    %235 = arith.addf %233, %234 : vector<8x128xf32>
    %236 = math.tanh %235 : vector<8x128xf32>
    %237 = arith.negf %235 : vector<8x128xf32>
    %238 = math.exp %237 : vector<8x128xf32>
    %cst_41 = arith.constant 1.000000e+00 : f32
    %239 = vector.broadcast %cst_41 : f32 to vector<8x128xf32>
    %240 = arith.addf %239, %238 : vector<8x128xf32>
    %241 = arith.divf %239, %240 : vector<8x128xf32>
    %242 = arith.select %5, %236, %241 : vector<8x128xi1>, vector<8x128xf32>
    %243 = vector.extract_strided_slice %242 {offsets = [0, 0], sizes = [8, 32], strides = [1, 1]} : vector<8x128xf32> to vector<8x32xf32>
    %244 = vector.extract_strided_slice %242 {offsets = [0, 32], sizes = [8, 32], strides = [1, 1]} : vector<8x128xf32> to vector<8x32xf32>
    %245 = vector.extract_strided_slice %242 {offsets = [0, 64], sizes = [8, 32], strides = [1, 1]} : vector<8x128xf32> to vector<8x32xf32>
    %246 = vector.extract_strided_slice %242 {offsets = [0, 96], sizes = [8, 32], strides = [1, 1]} : vector<8x128xf32> to vector<8x32xf32>
    %247 = arith.mulf %244, %230 : vector<8x32xf32>
    %248 = arith.mulf %243, %245 : vector<8x32xf32>
    %249 = arith.addf %247, %248 : vector<8x32xf32>
    %250 = math.tanh %249 : vector<8x32xf32>
    %251 = arith.mulf %246, %250 : vector<8x32xf32>
    %252 = vector.extract_strided_slice %173 {offsets = [32, 0], sizes = [8, 128], strides = [1, 1]} : vector<64x128xf32> to vector<8x128xf32>
    %cst_42 = arith.constant dense<0.000000e+00> : vector<8x128xf32>
    %253 = tpu.matmul %251, %169, %cst_42 {dimension_numbers = #tpu.dot_dimension_numbers<[1], [0], [0], [1], [0, 0, 1, 1], [], []>} : vector<8x32xf32>, vector<32x128xf32>, vector<8x128xf32> -> vector<8x128xf32>
    %254 = arith.addf %252, %253 : vector<8x128xf32>
    %255 = math.tanh %254 : vector<8x128xf32>
    %256 = arith.negf %254 : vector<8x128xf32>
    %257 = math.exp %256 : vector<8x128xf32>
    %cst_43 = arith.constant 1.000000e+00 : f32
    %258 = vector.broadcast %cst_43 : f32 to vector<8x128xf32>
    %259 = arith.addf %258, %257 : vector<8x128xf32>
    %260 = arith.divf %258, %259 : vector<8x128xf32>
    %261 = arith.select %5, %255, %260 : vector<8x128xi1>, vector<8x128xf32>
    %262 = vector.extract_strided_slice %261 {offsets = [0, 0], sizes = [8, 32], strides = [1, 1]} : vector<8x128xf32> to vector<8x32xf32>
    %263 = vector.extract_strided_slice %261 {offsets = [0, 32], sizes = [8, 32], strides = [1, 1]} : vector<8x128xf32> to vector<8x32xf32>
    %264 = vector.extract_strided_slice %261 {offsets = [0, 64], sizes = [8, 32], strides = [1, 1]} : vector<8x128xf32> to vector<8x32xf32>
    %265 = vector.extract_strided_slice %261 {offsets = [0, 96], sizes = [8, 32], strides = [1, 1]} : vector<8x128xf32> to vector<8x32xf32>
    %266 = arith.mulf %263, %249 : vector<8x32xf32>
    %267 = arith.mulf %262, %264 : vector<8x32xf32>
    %268 = arith.addf %266, %267 : vector<8x32xf32>
    %269 = math.tanh %268 : vector<8x32xf32>
    %270 = arith.mulf %265, %269 : vector<8x32xf32>
    %271 = vector.extract_strided_slice %173 {offsets = [40, 0], sizes = [8, 128], strides = [1, 1]} : vector<64x128xf32> to vector<8x128xf32>
    %cst_44 = arith.constant dense<0.000000e+00> : vector<8x128xf32>
    %272 = tpu.matmul %270, %169, %cst_44 {dimension_numbers = #tpu.dot_dimension_numbers<[1], [0], [0], [1], [0, 0, 1, 1], [], []>} : vector<8x32xf32>, vector<32x128xf32>, vector<8x128xf32> -> vector<8x128xf32>
    %273 = arith.addf %271, %272 : vector<8x128xf32>
    %274 = math.tanh %273 : vector<8x128xf32>
    %275 = arith.negf %273 : vector<8x128xf32>
    %276 = math.exp %275 : vector<8x128xf32>
    %cst_45 = arith.constant 1.000000e+00 : f32
    %277 = vector.broadcast %cst_45 : f32 to vector<8x128xf32>
    %278 = arith.addf %277, %276 : vector<8x128xf32>
    %279 = arith.divf %277, %278 : vector<8x128xf32>
    %280 = arith.select %5, %274, %279 : vector<8x128xi1>, vector<8x128xf32>
    %281 = vector.extract_strided_slice %280 {offsets = [0, 0], sizes = [8, 32], strides = [1, 1]} : vector<8x128xf32> to vector<8x32xf32>
    %282 = vector.extract_strided_slice %280 {offsets = [0, 32], sizes = [8, 32], strides = [1, 1]} : vector<8x128xf32> to vector<8x32xf32>
    %283 = vector.extract_strided_slice %280 {offsets = [0, 64], sizes = [8, 32], strides = [1, 1]} : vector<8x128xf32> to vector<8x32xf32>
    %284 = vector.extract_strided_slice %280 {offsets = [0, 96], sizes = [8, 32], strides = [1, 1]} : vector<8x128xf32> to vector<8x32xf32>
    %285 = arith.mulf %282, %268 : vector<8x32xf32>
    %286 = arith.mulf %281, %283 : vector<8x32xf32>
    %287 = arith.addf %285, %286 : vector<8x32xf32>
    %288 = math.tanh %287 : vector<8x32xf32>
    %289 = arith.mulf %284, %288 : vector<8x32xf32>
    %290 = vector.extract_strided_slice %173 {offsets = [48, 0], sizes = [8, 128], strides = [1, 1]} : vector<64x128xf32> to vector<8x128xf32>
    %cst_46 = arith.constant dense<0.000000e+00> : vector<8x128xf32>
    %291 = tpu.matmul %289, %169, %cst_46 {dimension_numbers = #tpu.dot_dimension_numbers<[1], [0], [0], [1], [0, 0, 1, 1], [], []>} : vector<8x32xf32>, vector<32x128xf32>, vector<8x128xf32> -> vector<8x128xf32>
    %292 = arith.addf %290, %291 : vector<8x128xf32>
    %293 = math.tanh %292 : vector<8x128xf32>
    %294 = arith.negf %292 : vector<8x128xf32>
    %295 = math.exp %294 : vector<8x128xf32>
    %cst_47 = arith.constant 1.000000e+00 : f32
    %296 = vector.broadcast %cst_47 : f32 to vector<8x128xf32>
    %297 = arith.addf %296, %295 : vector<8x128xf32>
    %298 = arith.divf %296, %297 : vector<8x128xf32>
    %299 = arith.select %5, %293, %298 : vector<8x128xi1>, vector<8x128xf32>
    %300 = vector.extract_strided_slice %299 {offsets = [0, 0], sizes = [8, 32], strides = [1, 1]} : vector<8x128xf32> to vector<8x32xf32>
    %301 = vector.extract_strided_slice %299 {offsets = [0, 32], sizes = [8, 32], strides = [1, 1]} : vector<8x128xf32> to vector<8x32xf32>
    %302 = vector.extract_strided_slice %299 {offsets = [0, 64], sizes = [8, 32], strides = [1, 1]} : vector<8x128xf32> to vector<8x32xf32>
    %303 = vector.extract_strided_slice %299 {offsets = [0, 96], sizes = [8, 32], strides = [1, 1]} : vector<8x128xf32> to vector<8x32xf32>
    %304 = arith.mulf %301, %287 : vector<8x32xf32>
    %305 = arith.mulf %300, %302 : vector<8x32xf32>
    %306 = arith.addf %304, %305 : vector<8x32xf32>
    %307 = math.tanh %306 : vector<8x32xf32>
    %308 = arith.mulf %303, %307 : vector<8x32xf32>
    %309 = vector.extract_strided_slice %173 {offsets = [56, 0], sizes = [8, 128], strides = [1, 1]} : vector<64x128xf32> to vector<8x128xf32>
    %cst_48 = arith.constant dense<0.000000e+00> : vector<8x128xf32>
    %310 = tpu.matmul %308, %169, %cst_48 {dimension_numbers = #tpu.dot_dimension_numbers<[1], [0], [0], [1], [0, 0, 1, 1], [], []>} : vector<8x32xf32>, vector<32x128xf32>, vector<8x128xf32> -> vector<8x128xf32>
    %311 = arith.addf %309, %310 : vector<8x128xf32>
    %312 = math.tanh %311 : vector<8x128xf32>
    %313 = arith.negf %311 : vector<8x128xf32>
    %314 = math.exp %313 : vector<8x128xf32>
    %cst_49 = arith.constant 1.000000e+00 : f32
    %315 = vector.broadcast %cst_49 : f32 to vector<8x128xf32>
    %316 = arith.addf %315, %314 : vector<8x128xf32>
    %317 = arith.divf %315, %316 : vector<8x128xf32>
    %318 = arith.select %5, %312, %317 : vector<8x128xi1>, vector<8x128xf32>
    %319 = vector.extract_strided_slice %318 {offsets = [0, 0], sizes = [8, 32], strides = [1, 1]} : vector<8x128xf32> to vector<8x32xf32>
    %320 = vector.extract_strided_slice %318 {offsets = [0, 32], sizes = [8, 32], strides = [1, 1]} : vector<8x128xf32> to vector<8x32xf32>
    %321 = vector.extract_strided_slice %318 {offsets = [0, 64], sizes = [8, 32], strides = [1, 1]} : vector<8x128xf32> to vector<8x32xf32>
    %322 = vector.extract_strided_slice %318 {offsets = [0, 96], sizes = [8, 32], strides = [1, 1]} : vector<8x128xf32> to vector<8x32xf32>
    %323 = arith.mulf %320, %306 : vector<8x32xf32>
    %324 = arith.mulf %319, %321 : vector<8x32xf32>
    %325 = arith.addf %323, %324 : vector<8x32xf32>
    %326 = math.tanh %325 : vector<8x32xf32>
    %327 = arith.mulf %322, %326 : vector<8x32xf32>
    %c0_50 = arith.constant 0 : index
    %c0_51 = arith.constant 0 : index
    %328 = vector.load %arg7[%c0_50, %c0_51] : memref<32x5xf32, #tpu.memory_space<vmem>>, vector<32x5xf32>
    %cst_52 = arith.constant dense<0.000000e+00> : vector<8x5xf32>
    %329 = tpu.matmul %327, %328, %cst_52 {dimension_numbers = #tpu.dot_dimension_numbers<[1], [0], [0], [1], [0, 0, 1, 1], [], []>} : vector<8x32xf32>, vector<32x5xf32>, vector<8x5xf32> -> vector<8x5xf32>
    %c0_53 = arith.constant 0 : index
    %c0_54 = arith.constant 0 : index
    %330 = vector.load %arg8[%c0_53, %c0_54] : memref<1x5xf32, #tpu.memory_space<vmem>>, vector<1x5xf32>
    %331 = vector.broadcast %330 : vector<1x5xf32> to vector<8x5xf32>
    %332 = arith.addf %329, %331 : vector<8x5xf32>
    %cst_55 = arith.constant dense<0xFF800000> : vector<8xf32>
    %333 = vector.multi_reduction <maximumf>, %332, %cst_55 [1] : vector<8x5xf32> to vector<8xf32>
    %334 = vector.shape_cast %333 : vector<8xf32> to vector<8x1xf32>
    %335 = vector.broadcast %334 : vector<8x1xf32> to vector<8x5xf32>
    %336 = arith.subf %332, %335 : vector<8x5xf32>
    %337 = math.exp %336 : vector<8x5xf32>
    %cst_56 = arith.constant dense<0.000000e+00> : vector<8xf32>
    %338 = vector.multi_reduction <add>, %337, %cst_56 [1] : vector<8x5xf32> to vector<8xf32>
    %339 = vector.shape_cast %338 : vector<8xf32> to vector<8x1xf32>
    %340 = tpu.reciprocal %339 {approx = true} : vector<8x1xf32> -> vector<8x1xf32>
    %341 = vector.broadcast %340 : vector<8x1xf32> to vector<8x5xf32>
    %342 = arith.mulf %337, %341 : vector<8x5xf32>
    %c0_57 = arith.constant 0 : index
    %c0_58 = arith.constant 0 : index
    %343 = vector.load %arg9[%c0_57, %c0_58] : memref<8x5xf32, #tpu.memory_space<vmem>>, vector<8x5xf32>
    tpu.vector_store %arg9[%c0_57, %c0_58], %342 {strides = array<i32>} : memref<8x5xf32, #tpu.memory_space<vmem>>, vector<8x5xf32>,
    return
  }
}

</mosaic_0001>

<bundles_post_ra>
// kernel: tpu_custom_call.1
= control target key start
LH: loop header
LB: loop body
LE: loop exit
PB: predicated region body
PF: predicated region fallthrough
CT: control target
= control target key end

     0   :  { %14 = vsyncpa [#allocation3], 0  ;;  %s1922_s0 = inlined_call_operand.vmem [shape: f32[64,16], index: 0, kind: input, shape index: {}]   ;;  %s1923_s1 = inlined_call_operand.hbm [shape: f32[16,128], index: 1, kind: input, shape index: {}]   ;;  %s1924_s2 = inlined_call_operand.vmem [shape: f32[32,128], index: 2, kind: input, shape index: {}]   ;;  %s1925_s3 = inlined_call_operand.vmem [shape: f32[1,128], index: 3, kind: input, shape index: {}]   ;;  %s1926_s4 = inlined_call_operand.vmem [shape: f32[32,128], index: 4, kind: input, shape index: {}]   ;;  %s1927_s5 = inlined_call_operand.vmem [shape: f32[32,128], index: 5, kind: input, shape index: {}]   ;;  %s1928_s6 = inlined_call_operand.vmem [shape: f32[1,128], index: 6, kind: input, shape index: {}]   ;;  %s1929_s7 = inlined_call_operand.vmem [shape: f32[32,5], index: 7, kind: input, shape index: {}]   ;;  %s1930_s8 = inlined_call_operand.vmem [shape: f32[1,5], index: 8, kind: input, shape index: {}]   ;;  %s1931_s9 = inlined_call_operand.hbm [shape: f32[8,5], index: 9, kind: output, shape index: {}]  }
   0x1   :  { %15 = vsyncpa [#allocation4], 0  ;;  %s22_s11 = sshll.u32 %s1923_s1, 4  ;;  %s1519_s12 = smov [#allocation2]   ;;  %s23_s11 = int_to_ptr.hbm [resolvable:$true] %s22_s11 }
   0x2   :  { %s24_s13 = sshll.u32 %s1519_s12, 4  ;;  %s1520_s14 = smov 128   ;;  %s25_s13 = int_to_ptr.vmem [resolvable:$true] %s24_s13 }
   0x3   :  { %s1521_s15 = smov 8  }
   0x4   :  { %30 = dma.hbm_to_vmem [thread:$0]  %s23_s11, 256, %s25_s13, [#allocation3], %s1520_s14, %s1520_s14, %s1521_s15  }
   0x5   :  { %1515 = dma.done.wait [#allocation3], 256  }
   0x6   :  { %1516 = vsyncadd [#allocation3], 4294967040  ;;  %v1582_v0 = vld [vmem:[%s1924_s2 + $0x18] sm:$0xff]  ;;  %v63_v1 = vld [vmem:[#allocation2 + $0x8] sm:$0xff]  ;;  %vm72_vm0 = vcmask 130048   ;;  %v1522_v7 = vmov 0.0   ;;  %v49_v16 = vlaneseq }
   0x7   :  { %v1587_v2 = vld [vmem:[%s1924_s2 + $0x10] sm:$0xff]  ;;  %154 = vmatpush.msra.mxu1 %v1582_v0  ;;  %111 = vmatpush.msra.mxu0 %v63_v1  ;;  %v62_v3 = vld [vmem:[#allocation2] sm:$0xff]  ;;  %v1596_v5 = vld [vmem:[%s1924_s2 + $0x8] sm:$0xff]  ;;  %s1523_s26 = smov 64   ;;  %s1524_s27 = smov 32   ;;  %vm138_vm8 = vcmask 261120  }
   0x8   :  { %v54_v4 = vld [vmem:[%s1922_s0] sm:$0xff]  ;;  %218 = vmatpush.msra.mxu2 %v1582_v0  ;;  %v50_v18 = vand.u32 127, %v49_v16  ;;  %v652_v37 = vld [vmem:[%s1926_s4 + $0x18] sm:$0xff]  ;;  %v651_v38 = vld [vmem:[%s1926_s4 + $0x10] sm:$0xff]  ;;  %s1267_s23 = sshll.u32 %s1931_s9, 4  ;;  %s1268_s23 = int_to_ptr.hbm [resolvable:$true] %s1267_s23 }
   0x9   :  { %155 = vmatpush.msra.mxu1 %v1587_v2  ;;  %112 = vmatpush.msra.mxu0 %v62_v3  ;;  %v1604_v6 = vld [vmem:[%s1924_s2] sm:$0xff]  ;;  %v650_v39 = vld [vmem:[%s1926_s4 + $0x8] sm:$0xff]  ;;  %v1216_v24 = vld [vmem:[%s1929_s7 + $0x10] sm:$0xff] }
   0xa   :  { %1277 = vmatmul.msk.f32.vlgmr.msra.gmra.mxu0 %vm72_vm0, %v54_v4  ;;  %219 = vmatpush.msra.mxu2 %v1587_v2  ;;  %v1631_v8 = vld [vmem:[%s1925_s3] ss:$0 sm:$0xff]  ;;  %vm51_vm1 = vcmp.ge.s32.totalorder %v50_v18, 64  ;;  %vm52_vm2 = vcmp.lt.s32.totalorder %v50_v18, 96  ;;  %v55_v43 = vld [vmem:[%s1922_s0 + $0x8] sm:$0xff] }
   0xb   :  { %156 = vmatpush.msra.mxu1 %v1596_v5  ;;  %474 = vmatpush.msrb.mxu0 %v1582_v0  ;;  %vm1634_vm4 = vmand %vm51_vm1, %vm52_vm2  ;;  %v649_v40 = vld [vmem:[%s1926_s4] sm:$0xff] }
   0xc   :  { %220 = vmatpush.msra.mxu2 %v1596_v5  ;;  %678 = vmatpush.msra.mxu3 %v652_v37 }
   0xd   :  { %157 = vmatpush.msra.mxu1 %v1604_v6  ;;  %475 = vmatpush.msrb.mxu0 %v1587_v2 }
   0xe   :  { %158 = vmatmul.f32.vlgmr.msra.gmra.mxu1 %v1522_v7  ;;  %221 = vmatpush.msra.mxu2 %v1604_v6 }
   0xf   :  { %346 = vmatpush.msrb.mxu1 %v1582_v0  ;;  %476 = vmatpush.msrb.mxu0 %v1596_v5 }
  0x10   :  { %282 = vmatpush.msrb.mxu2 %v1582_v0  ;;  %679 = vmatpush.msra.mxu3 %v651_v38  ;;  %v57_v38 = vld [vmem:[%s1922_s0 + $0x18] sm:$0xff] }
  0x11   :  { %347 = vmatpush.msrb.mxu1 %v1587_v2  ;;  %477 = vmatpush.msrb.mxu0 %v1604_v6 }
  0x12   :  { %283 = vmatpush.msrb.mxu2 %v1587_v2  ;;  %680 = vmatpush.msra.mxu3 %v650_v39 }
  0x13   :  { %348 = vmatpush.msrb.mxu1 %v1596_v5  ;;  %1278 = vmatmul.msk.f32.gmra.mxu0 %vm72_vm0, %v55_v43 }
  0x14   :  { %284 = vmatpush.msrb.mxu2 %v1596_v5  ;;  %681 = vmatpush.msra.mxu3 %v649_v40 }
  0x15   :  { %349 = vmatpush.msrb.mxu1 %v1604_v6 }
  0x16   :  { %285 = vmatpush.msrb.mxu2 %v1604_v6 }
  0x17   :  { %538 = vmatpush.msra.mxu1 %v1582_v0 }
  0x19   :  { %539 = vmatpush.msra.mxu1 %v1587_v2 }
  0x1b   :  { %540 = vmatpush.msra.mxu1 %v1596_v5 }
  0x1d   :  { %541 = vmatpush.msra.mxu1 %v1604_v6 }
  0x87   :  { %v114_v9 = vpop.f32.mrf.mxu0 }
  0x88   :  { %v115_v10 = vadd.f32 %v1631_v8, %v114_v9 }
  0x8b   :  { %v159_v11 = vpop.f32.mrf.mxu1 }
  0x8c   :  { %v162_v12 = vadd.f32 %v159_v11, %v115_v10 }
  0x8e   :  { %v1285_v13 = vmul.f32 -1.442695, %v162_v12 }
  0x90   :  { %1334 = vpow2.f32 %v1285_v13  ;;  %v117_v45 = vpop.f32.mrf.mxu0 }
  0x91   :  { %v118_v46 = vadd.f32 %v1631_v8, %v117_v45 }
  0x96   :  { %v1335_v14 = vpop.eup %1334 }
  0x97   :  { %v167_v15 = vadd.f32 1.0, %v1335_v14  ;;  %v56_v14 = vld [vmem:[%s1922_s0 + $0x10] sm:$0xff] }
  0x98   :  { %1279 = vmatmul.msk.f32.gmra.mxu0 %vm72_vm0, %v56_v14 }
  0x99   :  { %1336 = vrcp.f32 %v167_v15  ;;  %v179_v21 = vand.u32 2147483648, %v167_v15  ;;  %v177_v23 = vand.u32 2147483647, %v167_v15  ;;  %vm173_vm5 = vweird.f32 %v167_v15 }
  0x9a   :  { %1338 = vtanh.f32 %v162_v12 }
  0x9b   :  { %v180_v26 = vor.u32 1.1754944e-38, %v179_v21  ;;  %vm178_vm7 = vcmp.eq.f32.partialorder %v177_v23, 8.507059e+37 }
  0x9f   :  { %v1337_v17 = vpop.eup %1336 }
  0xa0   :  { %v169_v19 = vmul.f32 %v1337_v17, %v167_v15  ;;  %vm174_vm3 = vweird.f32 %v1337_v17  ;;  %v1339_v28 = vpop.eup %1338  ;;  %1280 = vmatmul.msk.f32.gmra.mxu0 %vm72_vm0, %v57_v38 }
  0xa1   :  { %vm175_vm6 = vmor %vm173_vm5, %vm174_vm3 }
  0xa2   :  { %v170_v20 = vsub.f32 1.0, %v169_v19 }
  0xa4   :  { %v171_v22 = vmul.f32 %v1337_v17, %v170_v20 }
  0xa6   :  { %v172_v25 = vadd.f32 %v1337_v17, %v171_v22 }
  0xa8   :  { %v176_v27 = vsel %vm175_vm6, %v1337_v17, %v172_v25 }
  0xa9   :  { %v181_v29 = vsel %vm178_vm7, %v180_v26, %v176_v27 }
  0xaa   :  { %v183_v30 = vsel %vm1634_vm4, %v1339_v28, %v181_v29 }
  0xab   :  { %186 = vrot.lane.b32.xlu0 %v183_v30, %s1523_s26  ;;  %v184_v33 = vmul.f32 0.0, %v183_v30 }
 0x115   :  { %v120_v16 = vpop.f32.mrf.mxu0 }
 0x116   :  { %v121_v17 = vadd.f32 %v1631_v8, %v120_v16 }
 0x11d   :  { %v187_v31 = vpop.permute.xlu0 %186 }
 0x11e   :  { %v189_v32 = vmul.f32 %v187_v31, %v183_v30 }
 0x120   :  { %191 = vrot.lane.b32.xlu0 %v189_v32, %s1524_s27 }
 0x192   :  { %v192_v34 = vpop.permute.xlu0 %191 }
 0x193   :  { %v194_v35 = vadd.f32 %v192_v34, %v184_v33 }
 0x195   :  { %1340 = vtanh.f32 %v194_v35 }
 0x19b   :  { %v1341_v36 = vpop.eup %1340 }
 0x19c   :  { %197 = vrot.lane.b32.xlu1 %v1341_v36, %s1523_s26 }
 0x20e   :  { %v198_v41 = vpop.permute.xlu1 %197 }
 0x20f   :  { %v200_v42 = vmul.f32 %v198_v41, %v183_v30 }
 0x211   :  { %202 = vrot.lane.b32.xlu1 %v200_v42, %s1524_s27  ;;  %v123_v42 = vpop.f32.mrf.mxu0 }
 0x212   :  { %v124_v43 = vadd.f32 %v1631_v8, %v123_v42 }
 0x283   :  { %v203_v44 = vpop.permute.xlu1 %202 }
 0x284   :  { %1286 = vmatmul.msk.f32.vlgmr.msra.gmra.mxu2 %vm138_vm8, %v203_v44  ;;  %1300 = vmatmul.msk.f32.vlgmr.msra.gmra.mxu3 %vm138_vm8, %v203_v44 }
 0x285   :  { %410 = vmatpush.msra.mxu2 %v1582_v0 }
 0x287   :  { %411 = vmatpush.msra.mxu2 %v1587_v2 }
 0x289   :  { %412 = vmatpush.msra.mxu2 %v1596_v5 }
 0x28b   :  { %413 = vmatpush.msra.mxu2 %v1604_v6 }
 0x307   :  { %v223_v47 = vpop.f32.mrf.mxu2 }
 0x308   :  { %v226_v48 = vadd.f32 %v223_v47, %v118_v46 }
 0x30a   :  { %v1287_v49 = vmul.f32 -1.442695, %v226_v48 }
 0x30c   :  { %1342 = vpow2.f32 %v1287_v49 }
 0x312   :  { %v1343_v50 = vpop.eup %1342 }
 0x313   :  { %v231_v51 = vadd.f32 1.0, %v1343_v50 }
 0x315   :  { %1344 = vrcp.f32 %v231_v51  ;;  %v243_v55 = vand.u32 2147483648, %v231_v51  ;;  %v241_v57 = vand.u32 2147483647, %v231_v51  ;;  %vm237_vm10 = vweird.f32 %v231_v51 }
 0x316   :  { %1346 = vtanh.f32 %v226_v48 }
 0x317   :  { %v244_v59 = vor.u32 1.1754944e-38, %v243_v55  ;;  %vm242_vm12 = vcmp.eq.f32.partialorder %v241_v57, 8.507059e+37 }
 0x31b   :  { %v1345_v52 = vpop.eup %1344 }
 0x31c   :  { %v233_v53 = vmul.f32 %v1345_v52, %v231_v51  ;;  %vm238_vm9 = vweird.f32 %v1345_v52  ;;  %v1347_v61 = vpop.eup %1346 }
 0x31d   :  { %vm239_vm11 = vmor %vm237_vm10, %vm238_vm9 }
 0x31e   :  { %v234_v54 = vsub.f32 1.0, %v233_v53 }
 0x320   :  { %v235_v56 = vmul.f32 %v1345_v52, %v234_v54 }
 0x322   :  { %v236_v58 = vadd.f32 %v1345_v52, %v235_v56 }
 0x324   :  { %v240_v60 = vsel %vm239_vm11, %v1345_v52, %v236_v58 }
 0x325   :  { %v245_v62 = vsel %vm242_vm12, %v244_v59, %v240_v60 }
 0x326   :  { %v247_v63 = vsel %vm1634_vm4, %v1347_v61, %v245_v62 }
 0x327   :  { %250 = vrot.lane.b32.xlu2 %v247_v63, %s1523_s26  ;;  %v248_v4 = vmul.f32 %v247_v63, %v194_v35 }
 0x381   :  { %v251_v1 = vpop.permute.xlu2 %250 }
 0x382   :  { %v253_v3 = vmul.f32 %v251_v1, %v247_v63 }
 0x384   :  { %255 = vrot.lane.b32.xlu2 %v253_v3, %s1524_s27 }
 0x3de   :  { %v256_v9 = vpop.permute.xlu2 %255 }
 0x3df   :  { %v258_v10 = vadd.f32 %v256_v9, %v248_v4 }
 0x3e1   :  { %1348 = vtanh.f32 %v258_v10 }
 0x3e7   :  { %v1349_v11 = vpop.eup %1348 }
 0x3e8   :  { %261 = vrot.lane.b32.xlu0 %v1349_v11, %s1523_s26  ;;  %v58_v11 = vld [vmem:[%s1922_s0 + $0x20] sm:$0xff] }
 0x3e9   :  { %1281 = vmatmul.msk.f32.gmra.mxu0 %vm72_vm0, %v58_v11 }
 0x45a   :  { %v262_v12 = vpop.permute.xlu0 %261 }
 0x45b   :  { %v264_v13 = vmul.f32 %v262_v12, %v247_v63 }
 0x45d   :  { %266 = vrot.lane.b32.xlu1 %v264_v13, %s1524_s27 }
 0x466   :  { %v126_v13 = vpop.f32.mrf.mxu0 }
 0x467   :  { %v127_v14 = vadd.f32 %v1631_v8, %v126_v13  ;;  %v1752_v13 = vld [vmem:[%s1927_s5 + $0x10] sm:$0xff] }
 0x4cf   :  { %v267_v15 = vpop.permute.xlu1 %266 }
 0x4d0   :  { %1288 = vmatmul.msk.f32.vlgmr.msrb.gmra.mxu2 %vm138_vm8, %v267_v15  ;;  %1301 = vmatmul.msk.f32.gmra.mxu3 %vm138_vm8, %v267_v15 }
 0x4d1   :  { %602 = vmatpush.msrb.mxu2 %v1582_v0 }
 0x4d3   :  { %603 = vmatpush.msrb.mxu2 %v1587_v2 }
 0x4d5   :  { %604 = vmatpush.msrb.mxu2 %v1596_v5 }
 0x4d7   :  { %605 = vmatpush.msrb.mxu2 %v1604_v6 }
 0x553   :  { %v287_v18 = vpop.f32.mrf.mxu2 }
 0x554   :  { %v290_v19 = vadd.f32 %v287_v18, %v121_v17 }
 0x556   :  { %v1289_v20 = vmul.f32 -1.442695, %v290_v19 }
 0x558   :  { %1350 = vpow2.f32 %v1289_v20 }
 0x55e   :  { %v1351_v21 = vpop.eup %1350 }
 0x55f   :  { %v295_v22 = vadd.f32 1.0, %v1351_v21 }
 0x561   :  { %1352 = vrcp.f32 %v295_v22  ;;  %v307_v0 = vand.u32 2147483648, %v295_v22  ;;  %v305_v5 = vand.u32 2147483647, %v295_v22  ;;  %vm301_vm14 = vweird.f32 %v295_v22 }
 0x562   :  { %1354 = vtanh.f32 %v290_v19 }
 0x563   :  { %v308_v6 = vor.u32 1.1754944e-38, %v307_v0  ;;  %vm306_vm1 = vcmp.eq.f32.partialorder %v305_v5, 8.507059e+37 }
 0x567   :  { %v1353_v23 = vpop.eup %1352 }
 0x568   :  { %v297_v25 = vmul.f32 %v1353_v23, %v295_v22  ;;  %vm302_vm13 = vweird.f32 %v1353_v23  ;;  %v1355_v29 = vpop.eup %1354 }
 0x569   :  { %vm303_vm15 = vmor %vm301_vm14, %vm302_vm13 }
 0x56a   :  { %v298_v26 = vsub.f32 1.0, %v297_v25 }
 0x56c   :  { %v299_v2 = vmul.f32 %v1353_v23, %v298_v26 }
 0x56e   :  { %v300_v27 = vadd.f32 %v1353_v23, %v299_v2 }
 0x570   :  { %v304_v28 = vsel %vm303_vm15, %v1353_v23, %v300_v27 }
 0x571   :  { %v309_v30 = vsel %vm306_vm1, %v308_v6, %v304_v28 }
 0x572   :  { %v311_v31 = vsel %vm1634_vm4, %v1355_v29, %v309_v30 }
 0x573   :  { %314 = vrot.lane.b32.xlu2 %v311_v31, %s1523_s26  ;;  %v312_v34 = vmul.f32 %v311_v31, %v258_v10 }
 0x5cd   :  { %v315_v32 = vpop.permute.xlu2 %314 }
 0x5ce   :  { %v317_v33 = vmul.f32 %v315_v32, %v311_v31 }
 0x5d0   :  { %319 = vrot.lane.b32.xlu0 %v317_v33, %s1524_s27 }
 0x642   :  { %v320_v35 = vpop.permute.xlu0 %319 }
 0x643   :  { %v322_v36 = vadd.f32 %v320_v35, %v312_v34  ;;  %v59_v35 = vld [vmem:[%s1922_s0 + $0x28] sm:$0xff] }
 0x644   :  { %1282 = vmatmul.msk.f32.gmra.mxu0 %vm72_vm0, %v59_v35 }
 0x645   :  { %1356 = vtanh.f32 %v322_v36 }
 0x64b   :  { %v1357_v37 = vpop.eup %1356 }
 0x64c   :  { %325 = vrot.lane.b32.xlu1 %v1357_v37, %s1523_s26  ;;  %v61_v37 = vld [vmem:[%s1922_s0 + $0x38] sm:$0xff] }
 0x6be   :  { %v326_v39 = vpop.permute.xlu1 %325 }
 0x6bf   :  { %v328_v40 = vmul.f32 %v326_v39, %v311_v31 }
 0x6c1   :  { %330 = vrot.lane.b32.xlu2 %v328_v40, %s1524_s27 }
 0x71b   :  { %v331_v41 = vpop.permute.xlu2 %330 }
 0x71c   :  { %1290 = vmatmul.msk.f32.vlgmr.msrb.gmra.mxu1 %vm138_vm8, %v331_v41  ;;  %1302 = vmatmul.msk.f32.gmra.mxu3 %vm138_vm8, %v331_v41  ;;  %v129_v41 = vpop.f32.mrf.mxu0 }
 0x799   :  { %v351_v44 = vpop.f32.mrf.mxu1 }
 0x79a   :  { %v354_v45 = vadd.f32 %v351_v44, %v124_v43  ;;  %v130_v44 = vadd.f32 %v1631_v8, %v129_v41 }
 0x79c   :  { %v1291_v46 = vmul.f32 -1.442695, %v354_v45 }
 0x79e   :  { %1358 = vpow2.f32 %v1291_v46 }
 0x7a4   :  { %v1359_v47 = vpop.eup %1358 }
 0x7a5   :  { %v359_v48 = vadd.f32 1.0, %v1359_v47 }
 0x7a7   :  { %1360 = vrcp.f32 %v359_v48  ;;  %v371_v52 = vand.u32 2147483648, %v359_v48  ;;  %v369_v54 = vand.u32 2147483647, %v359_v48  ;;  %vm365_vm3 = vweird.f32 %v359_v48 }
 0x7a8   :  { %1362 = vtanh.f32 %v354_v45 }
 0x7a9   :  { %v372_v56 = vor.u32 1.1754944e-38, %v371_v52  ;;  %vm370_vm6 = vcmp.eq.f32.partialorder %v369_v54, 8.507059e+37 }
 0x7ad   :  { %v1361_v49 = vpop.eup %1360 }
 0x7ae   :  { %v361_v50 = vmul.f32 %v1361_v49, %v359_v48  ;;  %vm366_vm2 = vweird.f32 %v1361_v49  ;;  %v1363_v58 = vpop.eup %1362 }
 0x7af   :  { %vm367_vm5 = vmor %vm365_vm3, %vm366_vm2 }
 0x7b0   :  { %v362_v51 = vsub.f32 1.0, %v361_v50 }
 0x7b2   :  { %v363_v53 = vmul.f32 %v1361_v49, %v362_v51 }
 0x7b4   :  { %v364_v55 = vadd.f32 %v1361_v49, %v363_v53 }
 0x7b6   :  { %v368_v57 = vsel %vm367_vm5, %v1361_v49, %v364_v55 }
 0x7b7   :  { %v373_v59 = vsel %vm370_vm6, %v372_v56, %v368_v57 }
 0x7b8   :  { %v375_v60 = vsel %vm1634_vm4, %v1363_v58, %v373_v59 }
 0x7b9   :  { %378 = vrot.lane.b32.xlu0 %v375_v60, %s1523_s26  ;;  %v376_v63 = vmul.f32 %v375_v60, %v322_v36  ;;  %v60_v36 = vld [vmem:[%s1922_s0 + $0x30] sm:$0xff] }
 0x7ba   :  { %1283 = vmatmul.msk.f32.gmra.mxu0 %vm72_vm0, %v60_v36 }
 0x7c2   :  { %1284 = vmatmul.msk.f32.gmra.mxu0 %vm72_vm0, %v61_v37 }
 0x82b   :  { %v379_v61 = vpop.permute.xlu0 %378 }
 0x82c   :  { %v381_v62 = vmul.f32 %v379_v61, %v375_v60 }
 0x82e   :  { %383 = vrot.lane.b32.xlu1 %v381_v62, %s1524_s27 }
 0x837   :  { %v1730_v42 = vpop.f32.mrf.mxu0 }
 0x83f   :  { %v1732_v43 = vpop.f32.mrf.mxu0 }
 0x8a0   :  { %v384_v1 = vpop.permute.xlu1 %383 }
 0x8a1   :  { %v386_v3 = vadd.f32 %v384_v1, %v376_v63 }
 0x8a3   :  { %1364 = vtanh.f32 %v386_v3 }
 0x8a9   :  { %v1365_v4 = vpop.eup %1364 }
 0x8aa   :  { %389 = vrot.lane.b32.xlu2 %v1365_v4, %s1523_s26 }
 0x904   :  { %v390_v9 = vpop.permute.xlu2 %389 }
 0x905   :  { %v392_v10 = vmul.f32 %v390_v9, %v375_v60 }
 0x907   :  { %394 = vrot.lane.b32.xlu0 %v392_v10, %s1524_s27 }
 0x979   :  { %v395_v12 = vpop.permute.xlu0 %394 }
 0x97a   :  { %1292 = vmatmul.msk.f32.vlgmr.msra.gmra.mxu2 %vm138_vm8, %v395_v12  ;;  %1303 = vmatmul.msk.f32.gmra.mxu3 %vm138_vm8, %v395_v12  ;;  %v1747_v12 = vld [vmem:[%s1927_s5 + $0x18] sm:$0xff] }
 0x97b   :  { %719 = vmatpush.msrb.mxu1 %v1747_v12  ;;  %783 = vmatpush.msra.mxu2 %v1747_v12 }
 0x97d   :  { %720 = vmatpush.msrb.mxu1 %v1752_v13  ;;  %784 = vmatpush.msra.mxu2 %v1752_v13 }
 0x9fd   :  { %v415_v15 = vpop.f32.mrf.mxu2 }
 0x9fe   :  { %v418_v16 = vadd.f32 %v415_v15, %v127_v14  ;;  %v1759_v14 = vld [vmem:[%s1927_s5 + $0x8] sm:$0xff]  ;;  %v1766_v15 = vld [vmem:[%s1927_s5] sm:$0xff] }
 0x9ff   :  { %721 = vmatpush.msrb.mxu1 %v1759_v14  ;;  %785 = vmatpush.msra.mxu2 %v1759_v14 }
 0xa00   :  { %v1293_v17 = vmul.f32 -1.442695, %v418_v16 }
 0xa01   :  { %722 = vmatpush.msrb.mxu1 %v1766_v15  ;;  %786 = vmatpush.msra.mxu2 %v1766_v15 }
 0xa02   :  { %1366 = vpow2.f32 %v1293_v17  ;;  %v133_v17 = vadd.f32 %v1631_v8, %v1730_v42 }
 0xa08   :  { %v1367_v18 = vpop.eup %1366 }
 0xa09   :  { %v423_v19 = vadd.f32 1.0, %v1367_v18 }
 0xa0b   :  { %1368 = vrcp.f32 %v423_v19  ;;  %v435_v23 = vand.u32 2147483648, %v423_v19  ;;  %v433_v26 = vand.u32 2147483647, %v423_v19  ;;  %vm429_vm9 = vweird.f32 %v423_v19 }
 0xa0c   :  { %1370 = vtanh.f32 %v418_v16 }
 0xa0d   :  { %v436_v2 = vor.u32 1.1754944e-38, %v435_v23  ;;  %vm434_vm11 = vcmp.eq.f32.partialorder %v433_v26, 8.507059e+37 }
 0xa11   :  { %v1369_v20 = vpop.eup %1368 }
 0xa12   :  { %v425_v21 = vmul.f32 %v1369_v20, %v423_v19  ;;  %vm430_vm7 = vweird.f32 %v1369_v20  ;;  %v1371_v27 = vpop.eup %1370 }
 0xa13   :  { %vm431_vm10 = vmor %vm429_vm9, %vm430_vm7 }
 0xa14   :  { %v426_v22 = vsub.f32 1.0, %v425_v21 }
 0xa16   :  { %v427_v25 = vmul.f32 %v1369_v20, %v426_v22 }
 0xa18   :  { %v428_v0 = vadd.f32 %v1369_v20, %v427_v25 }
 0xa1a   :  { %v432_v5 = vsel %vm431_vm10, %v1369_v20, %v428_v0  ;;  %v1788_v20 = vld [vmem:[%s1928_s6] ss:$0 sm:$0xff] }
 0xa1b   :  { %v437_v6 = vsel %vm434_vm11, %v436_v2, %v432_v5 }
 0xa1c   :  { %v439_v28 = vsel %vm1634_vm4, %v1371_v27, %v437_v6 }
 0xa1d   :  { %442 = vrot.lane.b32.xlu1 %v439_v28, %s1523_s26  ;;  %v440_v31 = vmul.f32 %v439_v28, %v386_v3 }
 0xa8f   :  { %v443_v29 = vpop.permute.xlu1 %442 }
 0xa90   :  { %v445_v30 = vmul.f32 %v443_v29, %v439_v28 }
 0xa92   :  { %447 = vrot.lane.b32.xlu2 %v445_v30, %s1524_s27 }
 0xaec   :  { %v448_v32 = vpop.permute.xlu2 %447 }
 0xaed   :  { %v450_v33 = vadd.f32 %v448_v32, %v440_v31 }
 0xaef   :  { %1372 = vtanh.f32 %v450_v33 }
 0xaf5   :  { %v1373_v34 = vpop.eup %1372 }
 0xaf6   :  { %453 = vrot.lane.b32.xlu0 %v1373_v34, %s1523_s26 }
 0xb68   :  { %v454_v38 = vpop.permute.xlu0 %453 }
 0xb69   :  { %v456_v39 = vmul.f32 %v454_v38, %v439_v28 }
 0xb6b   :  { %458 = vrot.lane.b32.xlu1 %v456_v39, %s1524_s27 }
 0xbdd   :  { %v459_v40 = vpop.permute.xlu1 %458 }
 0xbde   :  { %1294 = vmatmul.msk.f32.vlgmr.msrb.gmra.mxu0 %vm138_vm8, %v459_v40  ;;  %1304 = vmatmul.msk.f32.gmra.mxu3 %vm138_vm8, %v459_v40 }
 0xc5b   :  { %v479_v45 = vpop.f32.mrf.mxu0 }
 0xc5c   :  { %v482_v46 = vadd.f32 %v479_v45, %v130_v44 }
 0xc5e   :  { %v1295_v47 = vmul.f32 -1.442695, %v482_v46 }
 0xc60   :  { %1374 = vpow2.f32 %v1295_v47 }
 0xc66   :  { %v1375_v48 = vpop.eup %1374 }
 0xc67   :  { %v487_v49 = vadd.f32 1.0, %v1375_v48 }
 0xc69   :  { %1376 = vrcp.f32 %v487_v49  ;;  %v499_v53 = vand.u32 2147483648, %v487_v49  ;;  %v497_v55 = vand.u32 2147483647, %v487_v49  ;;  %vm493_vm12 = vweird.f32 %v487_v49 }
 0xc6a   :  { %1378 = vtanh.f32 %v482_v46 }
 0xc6b   :  { %v500_v57 = vor.u32 1.1754944e-38, %v499_v53  ;;  %vm498_vm14 = vcmp.eq.f32.partialorder %v497_v55, 8.507059e+37 }
 0xc6f   :  { %v1377_v50 = vpop.eup %1376 }
 0xc70   :  { %v489_v51 = vmul.f32 %v1377_v50, %v487_v49  ;;  %vm494_vm0 = vweird.f32 %v1377_v50  ;;  %v1379_v59 = vpop.eup %1378 }
 0xc71   :  { %vm495_vm13 = vmor %vm493_vm12, %vm494_vm0 }
 0xc72   :  { %v490_v52 = vsub.f32 1.0, %v489_v51 }
 0xc74   :  { %v491_v54 = vmul.f32 %v1377_v50, %v490_v52 }
 0xc76   :  { %v492_v56 = vadd.f32 %v1377_v50, %v491_v54 }
 0xc78   :  { %v496_v58 = vsel %vm495_vm13, %v1377_v50, %v492_v56 }
 0xc79   :  { %v501_v60 = vsel %vm498_vm14, %v500_v57, %v496_v58 }
 0xc7a   :  { %v503_v61 = vsel %vm1634_vm4, %v1379_v59, %v501_v60 }
 0xc7b   :  { %506 = vrot.lane.b32.xlu2 %v503_v61, %s1523_s26  ;;  %v504_v1 = vmul.f32 %v503_v61, %v450_v33 }
 0xcd5   :  { %v507_v62 = vpop.permute.xlu2 %506 }
 0xcd6   :  { %v509_v63 = vmul.f32 %v507_v62, %v503_v61 }
 0xcd8   :  { %511 = vrot.lane.b32.xlu0 %v509_v63, %s1524_s27 }
 0xd4a   :  { %v512_v3 = vpop.permute.xlu0 %511 }
 0xd4b   :  { %v1739_v4 = vadd.f32 %v512_v3, %v504_v1 }
 0xd4d   :  { %1380 = vtanh.f32 %v1739_v4 }
 0xd53   :  { %v1381_v9 = vpop.eup %1380 }
 0xd54   :  { %517 = vrot.lane.b32.xlu1 %v1381_v9, %s1523_s26 }
 0xdc6   :  { %v518_v10 = vpop.permute.xlu1 %517 }
 0xdc7   :  { %v520_v11 = vmul.f32 %v518_v10, %v503_v61 }
 0xdc9   :  { %522 = vrot.lane.b32.xlu2 %v520_v11, %s1524_s27 }
 0xe23   :  { %v523_v16 = vpop.permute.xlu2 %522 }
 0xe24   :  { %1296 = vmatmul.msk.f32.vlgmr.msra.gmra.mxu1 %vm138_vm8, %v523_v16  ;;  %1305 = vmatmul.msk.f32.gmra.mxu3 %vm138_vm8, %v523_v16 }
 0xe25   :  { %847 = vmatpush.msra.mxu1 %v1747_v12 }
 0xe27   :  { %848 = vmatpush.msra.mxu1 %v1752_v13 }
 0xe29   :  { %849 = vmatpush.msra.mxu1 %v1759_v14 }
 0xe2b   :  { %850 = vmatpush.msra.mxu1 %v1766_v15 }
 0xe2c   :  { %723 = vmatmul.f32.vlgmr.msrb.gmra.mxu1 %v1522_v7  ;;  %v683_v7 = vpop.f32.mrf.mxu3 }
 0xe2d   :  { %975 = vmatpush.msrb.mxu1 %v1747_v12  ;;  %v684_v22 = vadd.f32 %v1788_v20, %v683_v7 }
 0xe2f   :  { %976 = vmatpush.msrb.mxu1 %v1752_v13 }
 0xe31   :  { %977 = vmatpush.msrb.mxu1 %v1759_v14 }
 0xe33   :  { %978 = vmatpush.msrb.mxu1 %v1766_v15 }
 0xe34   :  { %v686_v16 = vpop.f32.mrf.mxu3 }
 0xea1   :  { %v543_v18 = vpop.f32.mrf.mxu1 }
 0xea2   :  { %v546_v19 = vadd.f32 %v543_v18, %v133_v17  ;;  %v687_v17 = vadd.f32 %v1788_v20, %v686_v16 }
 0xea4   :  { %v1297_v21 = vmul.f32 -1.442695, %v546_v19 }
 0xea6   :  { %1382 = vpow2.f32 %v1297_v21 }
 0xea9   :  { %v724_v23 = vpop.f32.mrf.mxu1 }
 0xeaa   :  { %v727_v25 = vadd.f32 %v724_v23, %v684_v22 }
 0xeac   :  { %v1383_v26 = vpop.eup %1382  ;;  %v1308_v0 = vmul.f32 -1.442695, %v727_v25 }
 0xead   :  { %v551_v2 = vadd.f32 1.0, %v1383_v26 }
 0xeae   :  { %1384 = vpow2.f32 %v1308_v0 }
 0xeaf   :  { %1386 = vrcp.f32 %v551_v2  ;;  %v563_v29 = vand.u32 2147483648, %v551_v2  ;;  %v561_v31 = vand.u32 2147483647, %v551_v2  ;;  %vm557_vm1 = vweird.f32 %v551_v2 }
 0xeb1   :  { %v564_v34 = vor.u32 1.1754944e-38, %v563_v29  ;;  %vm562_vm3 = vcmp.eq.f32.partialorder %v561_v31, 8.507059e+37 }
 0xeb4   :  { %v1385_v8 = vpop.eup %1384 }
 0xeb5   :  { %v1387_v5 = vpop.eup %1386  ;;  %v732_v27 = vadd.f32 1.0, %v1385_v8 }
 0xeb6   :  { %v553_v6 = vmul.f32 %v1387_v5, %v551_v2  ;;  %vm558_vm15 = vweird.f32 %v1387_v5 }
 0xeb7   :  { %1388 = vrcp.f32 %v732_v27  ;;  %vm559_vm2 = vmor %vm557_vm1, %vm558_vm15  ;;  %v744_v41 = vand.u32 2147483648, %v732_v27  ;;  %v742_v44 = vand.u32 2147483647, %v732_v27  ;;  %vm738_vm6 = vweird.f32 %v732_v27 }
 0xeb8   :  { %v554_v28 = vsub.f32 1.0, %v553_v6  ;;  %1390 = vtanh.f32 %v546_v19 }
 0xeb9   :  { %1392 = vtanh.f32 %v727_v25  ;;  %v745_v46 = vor.u32 1.1754944e-38, %v744_v41  ;;  %vm743_vm9 = vcmp.eq.f32.partialorder %v742_v44, 8.507059e+37 }
 0xeba   :  { %v555_v30 = vmul.f32 %v1387_v5, %v554_v28 }
 0xebc   :  { %v556_v32 = vadd.f32 %v1387_v5, %v555_v30 }
 0xebd   :  { %v1389_v33 = vpop.eup %1388 }
 0xebe   :  { %v560_v35 = vsel %vm559_vm2, %v1387_v5, %v556_v32  ;;  %v734_v36 = vmul.f32 %v1389_v33, %v732_v27  ;;  %v1391_v37 = vpop.eup %1390  ;;  %vm739_vm5 = vweird.f32 %v1389_v33 }
 0xebf   :  { %v565_v38 = vsel %vm562_vm3, %v564_v34, %v560_v35  ;;  %vm740_vm7 = vmor %vm738_vm6, %vm739_vm5  ;;  %v1393_v48 = vpop.eup %1392 }
 0xec0   :  { %v567_v39 = vsel %vm1634_vm4, %v1391_v37, %v565_v38  ;;  %v735_v40 = vsub.f32 1.0, %v734_v36 }
 0xec1   :  { %570 = vrot.lane.b32.xlu0 %v567_v39, %s1523_s26  ;;  %v568_v55 = vmul.f32 %v567_v39, %v1739_v4 }
 0xec2   :  { %v736_v42 = vmul.f32 %v1389_v33, %v735_v40  ;;  %v689_v40 = vpop.f32.mrf.mxu3 }
 0xec3   :  { %v690_v41 = vadd.f32 %v1788_v20, %v689_v40 }
 0xec4   :  { %v737_v45 = vadd.f32 %v1389_v33, %v736_v42 }
 0xec6   :  { %v741_v47 = vsel %vm740_vm7, %v1389_v33, %v737_v45 }
 0xec7   :  { %v746_v49 = vsel %vm743_vm9, %v745_v46, %v741_v47 }
 0xec8   :  { %v748_v50 = vsel %vm1634_vm4, %v1393_v48, %v746_v49 }
 0xec9   :  { %751 = vrot.lane.b32.xlu1 %v748_v50, %s1523_s26  ;;  %v749_v59 = vmul.f32 0.0, %v748_v50 }
 0xf33   :  { %v571_v51 = vpop.permute.xlu0 %570 }
 0xf34   :  { %v573_v52 = vmul.f32 %v571_v51, %v567_v39 }
 0xf36   :  { %575 = vrot.lane.b32.xlu2 %v573_v52, %s1524_s27 }
 0xf3b   :  { %v752_v53 = vpop.permute.xlu1 %751 }
 0xf3c   :  { %v754_v54 = vmul.f32 %v752_v53, %v748_v50 }
 0xf3e   :  { %756 = vrot.lane.b32.xlu0 %v754_v54, %s1524_s27 }
 0xf90   :  { %v576_v56 = vpop.permute.xlu2 %575 }
 0xf91   :  { %v1800_v57 = vadd.f32 %v576_v56, %v568_v55 }
 0xf93   :  { %1394 = vtanh.f32 %v1800_v57 }
 0xf99   :  { %v1395_v58 = vpop.eup %1394 }
 0xf9a   :  { %581 = vrot.lane.b32.xlu1 %v1395_v58, %s1523_s26 }
 0xfb0   :  { %v757_v60 = vpop.permute.xlu0 %756 }
 0xfb1   :  { %v759_v61 = vadd.f32 %v757_v60, %v749_v59 }
 0xfb3   :  { %1396 = vtanh.f32 %v759_v61 }
 0xfb9   :  { %v1397_v62 = vpop.eup %1396 }
 0xfba   :  { %762 = vrot.lane.b32.xlu2 %v1397_v62, %s1523_s26 }
0x100c   :  { %v582_v63 = vpop.permute.xlu1 %581 }
0x100d   :  { %v584_v1 = vmul.f32 %v582_v63, %v567_v39 }
0x100f   :  { %586 = vrot.lane.b32.xlu0 %v584_v1, %s1524_s27 }
0x1014   :  { %v763_v3 = vpop.permute.xlu2 %762 }
0x1015   :  { %v765_v4 = vmul.f32 %v763_v3, %v748_v50 }
0x1017   :  { %767 = vrot.lane.b32.xlu1 %v765_v4, %s1524_s27 }
0x1081   :  { %v587_v9 = vpop.permute.xlu0 %586 }
0x1082   :  { %1298 = vmatmul.msk.f32.vlgmr.msrb.gmra.mxu2 %vm138_vm8, %v587_v9  ;;  %1306 = vmatmul.msk.f32.gmra.mxu3 %vm138_vm8, %v587_v9 }
0x1083   :  { %911 = vmatpush.msrb.mxu2 %v1747_v12 }
0x1085   :  { %912 = vmatpush.msrb.mxu2 %v1752_v13 }
0x1087   :  { %913 = vmatpush.msrb.mxu2 %v1759_v14 }
0x1089   :  { %v768_v10 = vpop.permute.xlu1 %767  ;;  %914 = vmatpush.msrb.mxu2 %v1766_v15 }
0x108a   :  { %1309 = vmatmul.msk.f32.vlgmr.msra.gmra.mxu2 %vm138_vm8, %v768_v10 }
0x108b   :  { %1039 = vmatpush.msra.mxu2 %v1747_v12 }
0x108d   :  { %1040 = vmatpush.msra.mxu2 %v1752_v13 }
0x108f   :  { %1041 = vmatpush.msra.mxu2 %v1759_v14 }
0x1091   :  { %1042 = vmatpush.msra.mxu2 %v1766_v15 }
0x1105   :  { %v1818_v11 = vpop.f32.mrf.mxu2 }
0x110d   :  { %v788_v18 = vpop.f32.mrf.mxu2 }
0x110e   :  { %v791_v19 = vadd.f32 %v788_v18, %v687_v17  ;;  %v692_v17 = vpop.f32.mrf.mxu3 }
0x110f   :  { %v693_v18 = vadd.f32 %v1788_v20, %v692_v17 }
0x1110   :  { %v1310_v21 = vmul.f32 -1.442695, %v791_v19 }
0x1112   :  { %1398 = vpow2.f32 %v1310_v21 }
0x1118   :  { %v1399_v7 = vpop.eup %1398 }
0x1119   :  { %v796_v22 = vadd.f32 1.0, %v1399_v7 }
0x111b   :  { %1400 = vrcp.f32 %v796_v22  ;;  %v808_v0 = vand.u32 2147483648, %v796_v22  ;;  %v806_v8 = vand.u32 2147483647, %v796_v22  ;;  %vm802_vm11 = vweird.f32 %v796_v22 }
0x111c   :  { %1402 = vtanh.f32 %v791_v19 }
0x111d   :  { %v809_v27 = vor.u32 1.1754944e-38, %v808_v0  ;;  %vm807_vm12 = vcmp.eq.f32.partialorder %v806_v8, 8.507059e+37 }
0x1121   :  { %v1401_v23 = vpop.eup %1400 }
0x1122   :  { %v798_v25 = vmul.f32 %v1401_v23, %v796_v22  ;;  %vm803_vm10 = vweird.f32 %v1401_v23  ;;  %v1403_v28 = vpop.eup %1402 }
0x1123   :  { %vm804_vm0 = vmor %vm802_vm11, %vm803_vm10 }
0x1124   :  { %v799_v26 = vsub.f32 1.0, %v798_v25 }
0x1126   :  { %v800_v2 = vmul.f32 %v1401_v23, %v799_v26 }
0x1128   :  { %v801_v5 = vadd.f32 %v1401_v23, %v800_v2 }
0x112a   :  { %v805_v6 = vsel %vm804_vm0, %v1401_v23, %v801_v5 }
0x112b   :  { %v810_v29 = vsel %vm807_vm12, %v809_v27, %v805_v6 }
0x112c   :  { %v812_v30 = vsel %vm1634_vm4, %v1403_v28, %v810_v29 }
0x112d   :  { %815 = vrot.lane.b32.xlu2 %v812_v30, %s1523_s26  ;;  %v813_v33 = vmul.f32 %v812_v30, %v759_v61 }
0x1187   :  { %v816_v31 = vpop.permute.xlu2 %815 }
0x1188   :  { %v818_v32 = vmul.f32 %v816_v31, %v812_v30 }
0x118a   :  { %820 = vrot.lane.b32.xlu0 %v818_v32, %s1524_s27 }
0x11fc   :  { %v821_v34 = vpop.permute.xlu0 %820 }
0x11fd   :  { %v823_v35 = vadd.f32 %v821_v34, %v813_v33 }
0x11ff   :  { %1404 = vtanh.f32 %v823_v35 }
0x1205   :  { %v1405_v36 = vpop.eup %1404 }
0x1206   :  { %826 = vrot.lane.b32.xlu1 %v1405_v36, %s1523_s26 }
0x1278   :  { %v827_v37 = vpop.permute.xlu1 %826 }
0x1279   :  { %v829_v38 = vmul.f32 %v827_v37, %v812_v30  ;;  %v695_v37 = vpop.f32.mrf.mxu3 }
0x127b   :  { %831 = vrot.lane.b32.xlu2 %v829_v38, %s1524_s27  ;;  %v696_v38 = vadd.f32 %v1788_v20, %v695_v37 }
0x12d5   :  { %v832_v39 = vpop.permute.xlu2 %831 }
0x12d6   :  { %1311 = vmatmul.msk.f32.vlgmr.msra.gmra.mxu1 %vm138_vm8, %v832_v39 }
0x12d7   :  { %1103 = vmatpush.msra.mxu1 %v1747_v12 }
0x12d9   :  { %1104 = vmatpush.msra.mxu1 %v1752_v13 }
0x12db   :  { %1105 = vmatpush.msra.mxu1 %v1759_v14 }
0x12dd   :  { %1106 = vmatpush.msra.mxu1 %v1766_v15 }
0x1353   :  { %v852_v42 = vpop.f32.mrf.mxu1 }
0x1354   :  { %v855_v44 = vadd.f32 %v852_v42, %v690_v41 }
0x1356   :  { %v1312_v45 = vmul.f32 -1.442695, %v855_v44 }
0x1358   :  { %1406 = vpow2.f32 %v1312_v45 }
0x135e   :  { %v1407_v46 = vpop.eup %1406 }
0x135f   :  { %v860_v47 = vadd.f32 1.0, %v1407_v46 }
0x1361   :  { %1408 = vrcp.f32 %v860_v47  ;;  %v872_v51 = vand.u32 2147483648, %v860_v47  ;;  %v870_v53 = vand.u32 2147483647, %v860_v47  ;;  %vm866_vm14 = vweird.f32 %v860_v47 }
0x1362   :  { %1410 = vtanh.f32 %v855_v44 }
0x1363   :  { %v873_v55 = vor.u32 1.1754944e-38, %v872_v51  ;;  %vm871_vm1 = vcmp.eq.f32.partialorder %v870_v53, 8.507059e+37 }
0x1367   :  { %v1409_v48 = vpop.eup %1408 }
0x1368   :  { %v862_v49 = vmul.f32 %v1409_v48, %v860_v47  ;;  %vm867_vm13 = vweird.f32 %v1409_v48  ;;  %v1411_v58 = vpop.eup %1410 }
0x1369   :  { %vm868_vm15 = vmor %vm866_vm14, %vm867_vm13 }
0x136a   :  { %v863_v50 = vsub.f32 1.0, %v862_v49 }
0x136c   :  { %v864_v52 = vmul.f32 %v1409_v48, %v863_v50 }
0x136e   :  { %v865_v54 = vadd.f32 %v1409_v48, %v864_v52 }
0x1370   :  { %v869_v56 = vsel %vm868_vm15, %v1409_v48, %v865_v54 }
0x1371   :  { %v874_v59 = vsel %vm871_vm1, %v873_v55, %v869_v56 }
0x1372   :  { %v876_v60 = vsel %vm1634_vm4, %v1411_v58, %v874_v59 }
0x1373   :  { %879 = vrot.lane.b32.xlu0 %v876_v60, %s1523_s26  ;;  %v877_v63 = vmul.f32 %v876_v60, %v823_v35 }
0x13e5   :  { %v880_v61 = vpop.permute.xlu0 %879 }
0x13e6   :  { %v882_v62 = vmul.f32 %v880_v61, %v876_v60 }
0x13e8   :  { %884 = vrot.lane.b32.xlu1 %v882_v62, %s1524_s27 }
0x145a   :  { %v885_v1 = vpop.permute.xlu1 %884 }
0x145b   :  { %v887_v3 = vadd.f32 %v885_v1, %v877_v63 }
0x145d   :  { %1412 = vtanh.f32 %v887_v3 }
0x1463   :  { %v1413_v4 = vpop.eup %1412 }
0x1464   :  { %890 = vrot.lane.b32.xlu2 %v1413_v4, %s1523_s26 }
0x14be   :  { %v891_v9 = vpop.permute.xlu2 %890 }
0x14bf   :  { %v893_v10 = vmul.f32 %v891_v9, %v876_v60  ;;  %v698_v9 = vpop.f32.mrf.mxu3 }
0x14c1   :  { %895 = vrot.lane.b32.xlu0 %v893_v10, %s1524_s27  ;;  %v699_v10 = vadd.f32 %v1788_v20, %v698_v9 }
0x1533   :  { %v896_v16 = vpop.permute.xlu0 %895 }
0x1534   :  { %1313 = vmatmul.msk.f32.vlgmr.msrb.gmra.mxu2 %vm138_vm8, %v896_v16 }
0x1535   :  { %1167 = vmatpush.msrb.mxu2 %v1747_v12 }
0x1537   :  { %1168 = vmatpush.msrb.mxu2 %v1752_v13 }
0x1539   :  { %1169 = vmatpush.msrb.mxu2 %v1759_v14 }
0x153b   :  { %1170 = vmatpush.msrb.mxu2 %v1766_v15 }
0x15b7   :  { %v916_v19 = vpop.f32.mrf.mxu2 }
0x15b8   :  { %v919_v21 = vadd.f32 %v916_v19, %v693_v18 }
0x15ba   :  { %v1314_v7 = vmul.f32 -1.442695, %v919_v21 }
0x15bc   :  { %1414 = vpow2.f32 %v1314_v7 }
0x15c2   :  { %v1415_v22 = vpop.eup %1414 }
0x15c3   :  { %v924_v23 = vadd.f32 1.0, %v1415_v22 }
0x15c5   :  { %1416 = vrcp.f32 %v924_v23  ;;  %v936_v12 = vand.u32 2147483648, %v924_v23  ;;  %v934_v14 = vand.u32 2147483647, %v924_v23  ;;  %vm930_vm3 = vweird.f32 %v924_v23 }
0x15c6   :  { %1418 = vtanh.f32 %v919_v21 }
0x15c7   :  { %v937_v15 = vor.u32 1.1754944e-38, %v936_v12  ;;  %vm935_vm6 = vcmp.eq.f32.partialorder %v934_v14, 8.507059e+37 }
0x15cb   :  { %v1417_v25 = vpop.eup %1416 }
0x15cc   :  { %v926_v26 = vmul.f32 %v1417_v25, %v924_v23  ;;  %vm931_vm2 = vweird.f32 %v1417_v25  ;;  %v1419_v5 = vpop.eup %1418 }
0x15cd   :  { %vm932_vm5 = vmor %vm930_vm3, %vm931_vm2 }
0x15ce   :  { %v927_v0 = vsub.f32 1.0, %v926_v26 }
0x15d0   :  { %v928_v13 = vmul.f32 %v1417_v25, %v927_v0 }
0x15d2   :  { %v929_v2 = vadd.f32 %v1417_v25, %v928_v13 }
0x15d4   :  { %v933_v8 = vsel %vm932_vm5, %v1417_v25, %v929_v2 }
0x15d5   :  { %v938_v27 = vsel %vm935_vm6, %v937_v15, %v933_v8 }
0x15d6   :  { %v940_v6 = vsel %vm1634_vm4, %v1419_v5, %v938_v27  ;;  %v1466_v5 = vld [vmem:[%s1925_s3] ss:$0 sm:$0xff] }
0x15d7   :  { %943 = vrot.lane.b32.xlu1 %v940_v6, %s1523_s26  ;;  %v941_v30 = vmul.f32 %v940_v6, %v887_v3  ;;  %v136_v27 = vadd.f32 %v1466_v5, %v1732_v43 }
0x1649   :  { %v944_v28 = vpop.permute.xlu1 %943 }
0x164a   :  { %v946_v29 = vmul.f32 %v944_v28, %v940_v6 }
0x164c   :  { %948 = vrot.lane.b32.xlu2 %v946_v29, %s1524_s27 }
0x16a6   :  { %v949_v31 = vpop.permute.xlu2 %948 }
0x16a7   :  { %v951_v32 = vadd.f32 %v949_v31, %v941_v30 }
0x16a9   :  { %1420 = vtanh.f32 %v951_v32 }
0x16af   :  { %v1421_v33 = vpop.eup %1420 }
0x16b0   :  { %954 = vrot.lane.b32.xlu0 %v1421_v33, %s1523_s26 }
0x1722   :  { %v955_v34 = vpop.permute.xlu0 %954 }
0x1723   :  { %v957_v35 = vmul.f32 %v955_v34, %v940_v6  ;;  %v610_v6 = vadd.f32 %v1818_v11, %v136_v27 }
0x1725   :  { %959 = vrot.lane.b32.xlu1 %v957_v35, %s1524_s27  ;;  %v1299_v28 = vmul.f32 -1.442695, %v610_v6 }
0x1797   :  { %v960_v36 = vpop.permute.xlu1 %959 }
0x1798   :  { %1315 = vmatmul.msk.f32.vlgmr.msrb.gmra.mxu1 %vm138_vm8, %v960_v36 }
0x1815   :  { %v980_v39 = vpop.f32.mrf.mxu1 }
0x1816   :  { %v983_v40 = vadd.f32 %v980_v39, %v696_v38 }
0x1818   :  { %v1316_v41 = vmul.f32 -1.442695, %v983_v40 }
0x181a   :  { %1422 = vpow2.f32 %v1316_v41 }
0x1820   :  { %v1423_v42 = vpop.eup %1422 }
0x1821   :  { %v988_v44 = vadd.f32 1.0, %v1423_v42 }
0x1823   :  { %1424 = vrcp.f32 %v988_v44  ;;  %v1000_v48 = vand.u32 2147483648, %v988_v44  ;;  %v998_v50 = vand.u32 2147483647, %v988_v44  ;;  %vm994_vm9 = vweird.f32 %v988_v44 }
0x1824   :  { %1426 = vtanh.f32 %v983_v40 }
0x1825   :  { %v1001_v52 = vor.u32 1.1754944e-38, %v1000_v48  ;;  %vm999_vm11 = vcmp.eq.f32.partialorder %v998_v50, 8.507059e+37 }
0x1829   :  { %v1425_v45 = vpop.eup %1424 }
0x182a   :  { %v990_v46 = vmul.f32 %v1425_v45, %v988_v44  ;;  %vm995_vm7 = vweird.f32 %v1425_v45  ;;  %v1427_v54 = vpop.eup %1426 }
0x182b   :  { %vm996_vm10 = vmor %vm994_vm9, %vm995_vm7 }
0x182c   :  { %v991_v47 = vsub.f32 1.0, %v990_v46 }
0x182e   :  { %v992_v49 = vmul.f32 %v1425_v45, %v991_v47 }
0x1830   :  { %v993_v51 = vadd.f32 %v1425_v45, %v992_v49 }
0x1832   :  { %v997_v53 = vsel %vm996_vm10, %v1425_v45, %v993_v51 }
0x1833   :  { %v1002_v55 = vsel %vm999_vm11, %v1001_v52, %v997_v53  ;;  %v701_v53 = vpop.f32.mrf.mxu3 }
0x1834   :  { %v1004_v56 = vsel %vm1634_vm4, %v1427_v54, %v1002_v55  ;;  %v702_v54 = vadd.f32 %v1788_v20, %v701_v53 }
0x1835   :  { %1007 = vrot.lane.b32.xlu2 %v1004_v56, %s1523_s26  ;;  %v1005_v60 = vmul.f32 %v1004_v56, %v951_v32 }
0x188f   :  { %v1008_v58 = vpop.permute.xlu2 %1007 }
0x1890   :  { %v1010_v59 = vmul.f32 %v1008_v58, %v1004_v56 }
0x1892   :  { %1012 = vrot.lane.b32.xlu0 %v1010_v59, %s1524_s27 }
0x1904   :  { %v1013_v61 = vpop.permute.xlu0 %1012 }
0x1905   :  { %v1857_v62 = vadd.f32 %v1013_v61, %v1005_v60 }
0x1907   :  { %1428 = vtanh.f32 %v1857_v62 }
0x190d   :  { %v1429_v63 = vpop.eup %1428 }
0x190e   :  { %1018 = vrot.lane.b32.xlu1 %v1429_v63, %s1523_s26 }
0x1980   :  { %v1019_v1 = vpop.permute.xlu1 %1018 }
0x1981   :  { %v1021_v3 = vmul.f32 %v1019_v1, %v1004_v56 }
0x1983   :  { %1023 = vrot.lane.b32.xlu2 %v1021_v3, %s1524_s27 }
0x19dd   :  { %v1024_v4 = vpop.permute.xlu2 %1023 }
0x19de   :  { %1317 = vmatmul.msk.f32.vlgmr.msra.gmra.mxu2 %vm138_vm8, %v1024_v4 }
0x1a61   :  { %v1044_v16 = vpop.f32.mrf.mxu2 }
0x1a62   :  { %v1047_v17 = vadd.f32 %v1044_v16, %v699_v10 }
0x1a64   :  { %v1318_v18 = vmul.f32 -1.442695, %v1047_v17 }
0x1a66   :  { %1430 = vpow2.f32 %v1318_v18 }
0x1a6c   :  { %v1431_v19 = vpop.eup %1430 }
0x1a6d   :  { %v1052_v21 = vadd.f32 1.0, %v1431_v19 }
0x1a6f   :  { %1432 = vrcp.f32 %v1052_v21  ;;  %v1064_v25 = vand.u32 2147483648, %v1052_v21  ;;  %v1062_v0 = vand.u32 2147483647, %v1052_v21  ;;  %vm1058_vm12 = vweird.f32 %v1052_v21 }
0x1a70   :  { %1434 = vtanh.f32 %v1047_v17 }
0x1a71   :  { %v1065_v13 = vor.u32 1.1754944e-38, %v1064_v25  ;;  %vm1063_vm14 = vcmp.eq.f32.partialorder %v1062_v0, 8.507059e+37  ;;  %1436 = vpow2.f32 %v1299_v28 }
0x1a75   :  { %v1433_v7 = vpop.eup %1432 }
0x1a76   :  { %v1054_v22 = vmul.f32 %v1433_v7, %v1052_v21  ;;  %vm1059_vm0 = vweird.f32 %v1433_v7  ;;  %v1435_v2 = vpop.eup %1434 }
0x1a77   :  { %vm1060_vm13 = vmor %vm1058_vm12, %vm1059_vm0  ;;  %v1437_v29 = vpop.eup %1436 }
0x1a78   :  { %v1055_v23 = vsub.f32 1.0, %v1054_v22  ;;  %v615_v30 = vadd.f32 1.0, %v1437_v29 }
0x1a7a   :  { %v1056_v26 = vmul.f32 %v1433_v7, %v1055_v23  ;;  %1438 = vrcp.f32 %v615_v30  ;;  %v627_v38 = vand.u32 2147483648, %v615_v30  ;;  %vm621_vm1 = vweird.f32 %v615_v30 }
0x1a7b   :  { %v625_v39 = vand.u32 2147483647, %v615_v30  ;;  %1440 = vtanh.f32 %v610_v6 }
0x1a7c   :  { %v1057_v12 = vadd.f32 %v1433_v7, %v1056_v26  ;;  %v628_v11 = vor.u32 1.1754944e-38, %v627_v38 }
0x1a7d   :  { %vm626_vm3 = vcmp.eq.f32.partialorder %v625_v39, 8.507059e+37 }
0x1a7e   :  { %v1061_v14 = vsel %vm1060_vm13, %v1433_v7, %v1057_v12 }
0x1a7f   :  { %v1066_v15 = vsel %vm1063_vm14, %v1065_v13, %v1061_v14 }
0x1a80   :  { %v1068_v8 = vsel %vm1634_vm4, %v1435_v2, %v1066_v15  ;;  %v1439_v31 = vpop.eup %1438 }
0x1a81   :  { %1071 = vrot.lane.b32.xlu0 %v1068_v8, %s1523_s26  ;;  %v617_v32 = vmul.f32 %v1439_v31, %v615_v30  ;;  %vm622_vm15 = vweird.f32 %v1439_v31  ;;  %v1441_v41 = vpop.eup %1440  ;;  %v1069_v44 = vmul.f32 %v1068_v8, %v1857_v62 }
0x1a82   :  { %vm623_vm2 = vmor %vm621_vm1, %vm622_vm15 }
0x1a83   :  { %v618_v33 = vsub.f32 1.0, %v617_v32 }
0x1a85   :  { %v619_v34 = vmul.f32 %v1439_v31, %v618_v33 }
0x1a87   :  { %v620_v36 = vadd.f32 %v1439_v31, %v619_v34 }
0x1a89   :  { %v624_v43 = vsel %vm623_vm2, %v1439_v31, %v620_v36 }
0x1a8a   :  { %v629_v40 = vsel %vm626_vm3, %v628_v11, %v624_v43 }
0x1a8b   :  { %v631_v42 = vsel %vm1634_vm4, %v1441_v41, %v629_v40 }
0x1a8c   :  { %v632_v10 = vmul.f32 %v631_v42, %v1800_v57 }
0x1af3   :  { %v1072_v35 = vpop.permute.xlu0 %1071 }
0x1af4   :  { %v1074_v37 = vmul.f32 %v1072_v35, %v1068_v8 }
0x1af6   :  { %1076 = vrot.lane.b32.xlu1 %v1074_v37, %s1524_s27 }
0x1afe   :  { %634 = vrot.lane.b32.xlu1 %v631_v42, %s1523_s26 }
0x1b68   :  { %v1077_v45 = vpop.permute.xlu1 %1076 }
0x1b69   :  { %v1079_v46 = vadd.f32 %v1077_v45, %v1069_v44 }
0x1b6b   :  { %1442 = vtanh.f32 %v1079_v46 }
0x1b70   :  { %v635_v50 = vpop.permute.xlu1 %634 }
0x1b71   :  { %v1443_v47 = vpop.eup %1442  ;;  %v637_v51 = vmul.f32 %v635_v50, %v631_v42  ;;  %v1217_v50 = vld [vmem:[%s1929_s7 + $0x18] sm:$0xff] }
0x1b72   :  { %1082 = vrot.lane.b32.xlu2 %v1443_v47, %s1523_s26  ;;  %1239 = vmatpush.msrb.mxu1 %v1217_v50 }
0x1b74   :  { %1240 = vmatpush.msrb.mxu1 %v1216_v24 }
0x1bcc   :  { %v1083_v48 = vpop.permute.xlu2 %1082 }
0x1bcd   :  { %v1085_v49 = vmul.f32 %v1083_v48, %v1068_v8 }
0x1bcf   :  { %1087 = vrot.lane.b32.xlu0 %v1085_v49, %s1524_s27 }
0x1bd7   :  { %639 = vrot.lane.b32.xlu0 %v637_v51, %s1524_s27  ;;  %v1215_v51 = vld [vmem:[%s1929_s7 + $0x8] sm:$0xff] }
0x1bd8   :  { %1241 = vmatpush.msrb.mxu1 %v1215_v51 }
0x1c41   :  { %v1088_v52 = vpop.permute.xlu0 %1087 }
0x1c42   :  { %1319 = vmatmul.msk.f32.vlgmr.msra.gmra.mxu1 %vm138_vm8, %v1088_v52  ;;  %v1214_v52 = vld [vmem:[%s1929_s7] sm:$0xff]  ;;  %s1525_s7 = smov [#allocation5]  }
0x1c43   :  { %1242 = vmatpush.msrb.mxu1 %v1214_v52 }
0x1c49   :  { %v640_v9 = vpop.permute.xlu0 %639 }
0x1c4a   :  { %v642_v18 = vadd.f32 %v640_v9, %v632_v10 }
0x1cbf   :  { %v1108_v55 = vpop.f32.mrf.mxu1 }
0x1cc0   :  { %v1111_v56 = vadd.f32 %v1108_v55, %v702_v54 }
0x1cc2   :  { %v1320_v58 = vmul.f32 -1.442695, %v1111_v56 }
0x1cc4   :  { %1444 = vpow2.f32 %v1320_v58 }
0x1cca   :  { %v1445_v59 = vpop.eup %1444 }
0x1ccb   :  { %v1116_v60 = vadd.f32 1.0, %v1445_v59 }
0x1ccd   :  { %1446 = vrcp.f32 %v1116_v60  ;;  %v1128_v1 = vand.u32 2147483648, %v1116_v60  ;;  %v1126_v4 = vand.u32 2147483647, %v1116_v60  ;;  %vm1122_vm6 = vweird.f32 %v1116_v60 }
0x1cce   :  { %1448 = vtanh.f32 %v1111_v56  ;;  %v1333_v56 = vld [vmem:[%s1930_s8] ss:$0 sm:$0xff] }
0x1ccf   :  { %v1129_v17 = vor.u32 1.1754944e-38, %v1128_v1  ;;  %vm1127_vm9 = vcmp.eq.f32.partialorder %v1126_v4, 8.507059e+37  ;;  %1450 = vtanh.f32 %v642_v18 }
0x1cd3   :  { %v1447_v61 = vpop.eup %1446 }
0x1cd4   :  { %v1118_v62 = vmul.f32 %v1447_v61, %v1116_v60  ;;  %vm1123_vm5 = vweird.f32 %v1447_v61  ;;  %v1449_v21 = vpop.eup %1448 }
0x1cd5   :  { %vm1124_vm7 = vmor %vm1122_vm6, %vm1123_vm5  ;;  %v1451_v23 = vpop.eup %1450 }
0x1cd6   :  { %v1119_v63 = vsub.f32 1.0, %v1118_v62 }
0x1cd8   :  { %v1120_v3 = vmul.f32 %v1447_v61, %v1119_v63 }
0x1cda   :  { %v1121_v16 = vadd.f32 %v1447_v61, %v1120_v3 }
0x1cdc   :  { %v1125_v19 = vsel %vm1124_vm7, %v1447_v61, %v1121_v16 }
0x1cdd   :  { %v1130_v7 = vsel %vm1127_vm9, %v1129_v17, %v1125_v19 }
0x1cde   :  { %v1132_v22 = vsel %vm1634_vm4, %v1449_v21, %v1130_v7 }
0x1cdf   :  { %1135 = vrot.lane.b32.xlu2 %v1132_v22, %s1523_s26  ;;  %v1133_v12 = vmul.f32 %v1132_v22, %v1079_v46 }
0x1ce7   :  { %645 = vrot.lane.b32.xlu2 %v1451_v23, %s1523_s26 }
0x1d39   :  { %v1136_v25 = vpop.permute.xlu2 %1135 }
0x1d3a   :  { %v1138_v57 = vmul.f32 %v1136_v25, %v1132_v22 }
0x1d3c   :  { %1140 = vrot.lane.b32.xlu1 %v1138_v57, %s1524_s27 }
0x1d41   :  { %v646_v26 = vpop.permute.xlu2 %645 }
0x1d42   :  { %v648_v0 = vmul.f32 %v646_v26, %v631_v42 }
0x1d44   :  { %662 = vrot.lane.b32.xlu1 %v648_v0, %s1524_s27 }
0x1dae   :  { %v1141_v13 = vpop.permute.xlu1 %1140 }
0x1daf   :  { %v1143_v14 = vadd.f32 %v1141_v13, %v1133_v12 }
0x1db1   :  { %1452 = vtanh.f32 %v1143_v14 }
0x1db6   :  { %v663_v2 = vpop.permute.xlu1 %662 }
0x1db7   :  { %v1453_v15 = vpop.eup %1452  ;;  %1307 = vmatmul.msk.f32.gmra.mxu3 %vm138_vm8, %v663_v2 }
0x1db8   :  { %1146 = vrot.lane.b32.xlu0 %v1453_v15, %s1523_s26 }
0x1e2a   :  { %v1147_v8 = vpop.permute.xlu0 %1146 }
0x1e2b   :  { %v1149_v5 = vmul.f32 %v1147_v8, %v1132_v22 }
0x1e2d   :  { %1151 = vrot.lane.b32.xlu2 %v1149_v5, %s1524_s27 }
0x1e3a   :  { %v704_v6 = vpop.f32.mrf.mxu3 }
0x1e3b   :  { %v705_v28 = vadd.f32 %v1788_v20, %v704_v6 }
0x1e87   :  { %v1152_v27 = vpop.permute.xlu2 %1151 }
0x1e88   :  { %1321 = vmatmul.msk.f32.vlgmr.msrb.gmra.mxu2 %vm138_vm8, %v1152_v27 }
0x1f0b   :  { %v1172_v29 = vpop.f32.mrf.mxu2 }
0x1f0c   :  { %v1175_v30 = vadd.f32 %v1172_v29, %v705_v28 }
0x1f0e   :  { %v1322_v31 = vmul.f32 -1.442695, %v1175_v30 }
0x1f10   :  { %1454 = vpow2.f32 %v1322_v31 }
0x1f16   :  { %v1455_v32 = vpop.eup %1454 }
0x1f17   :  { %v1180_v33 = vadd.f32 1.0, %v1455_v32 }
0x1f19   :  { %1456 = vrcp.f32 %v1180_v33  ;;  %v1192_v37 = vand.u32 2147483648, %v1180_v33  ;;  %v1190_v39 = vand.u32 2147483647, %v1180_v33  ;;  %vm1186_vm11 = vweird.f32 %v1180_v33 }
0x1f1a   :  { %1458 = vtanh.f32 %v1175_v30 }
0x1f1b   :  { %v1193_v11 = vor.u32 1.1754944e-38, %v1192_v37  ;;  %vm1191_vm12 = vcmp.eq.f32.partialorder %v1190_v39, 8.507059e+37 }
0x1f1f   :  { %v1457_v34 = vpop.eup %1456 }
0x1f20   :  { %v1182_v35 = vmul.f32 %v1457_v34, %v1180_v33  ;;  %vm1187_vm10 = vweird.f32 %v1457_v34  ;;  %v1459_v40 = vpop.eup %1458 }
0x1f21   :  { %vm1188_vm0 = vmor %vm1186_vm11, %vm1187_vm10 }
0x1f22   :  { %v1183_v36 = vsub.f32 1.0, %v1182_v35 }
0x1f24   :  { %v1184_v38 = vmul.f32 %v1457_v34, %v1183_v36 }
0x1f26   :  { %v1185_v43 = vadd.f32 %v1457_v34, %v1184_v38 }
0x1f28   :  { %v1189_v20 = vsel %vm1188_vm0, %v1457_v34, %v1185_v43 }
0x1f29   :  { %v1194_v41 = vsel %vm1191_vm12, %v1193_v11, %v1189_v20 }
0x1f2a   :  { %v1196_v42 = vsel %vm1634_vm4, %v1459_v40, %v1194_v41  ;;  %vm1247_vm4 = vcmask 39936  }
0x1f2b   :  { %1199 = vrot.lane.b32.xlu0 %v1196_v42, %s1523_s26  ;;  %v1197_v46 = vmul.f32 %v1196_v42, %v1143_v14 }
0x1f9d   :  { %v1200_v44 = vpop.permute.xlu0 %1199 }
0x1f9e   :  { %v1202_v45 = vmul.f32 %v1200_v44, %v1196_v42 }
0x1fa0   :  { %1204 = vrot.lane.b32.xlu1 %v1202_v45, %s1524_s27 }
0x2012   :  { %v1205_v47 = vpop.permute.xlu1 %1204 }
0x2013   :  { %v1207_v48 = vadd.f32 %v1205_v47, %v1197_v46 }
0x2015   :  { %1460 = vtanh.f32 %v1207_v48 }
0x201b   :  { %v1461_v49 = vpop.eup %1460 }
0x201c   :  { %1210 = vrot.lane.b32.xlu2 %v1461_v49, %s1523_s26 }
0x2076   :  { %v1211_v53 = vpop.permute.xlu2 %1210 }
0x2077   :  { %v1213_v54 = vmul.f32 %v1211_v53, %v1196_v42 }
0x2079   :  { %1223 = vrot.lane.b32.xlu0 %v1213_v54, %s1524_s27  ;;  %s1265_s27 = sshll.u32 %s1525_s7, 4  ;;  %s1266_s27 = int_to_ptr.vmem [resolvable:$true] %s1265_s27 }
0x20eb   :  { %v1224_v55 = vpop.permute.xlu0 %1223 }
0x20ec   :  { %1323 = vmatmul.msk.f32.vlgmr.msrb.gmra.mxu1 %vm138_vm8, %v1224_v55 }
0x2169   :  { %v1244_v58 = vpop.f32.mrf.mxu1 }
0x216a   :  { %v1245_v59 = vadd.f32 %v1333_v56, %v1244_v58 }
0x216c   :  { %v1248_v60 = vsel %vm1247_vm4, %v1245_v59, -inf }
0x216d   :  { %1249 = vmax.xlane.f32.xlu1 %v1248_v60 }
0x21e0   :  { %v1250_v61 = vpop.xlane.xlu1 %1249 }
0x21e1   :  { %v1251_v62 = vsub.f32 %v1245_v59, %v1250_v61 }
0x21e3   :  { %v1252_v63 = vmul.f32 1.442695, %v1251_v62 }
0x21e5   :  { %1462 = vpow2.f32 %v1252_v63 }
0x21eb   :  { %v1463_v1 = vpop.eup %1462 }
0x21ec   :  { %v1254_v3 = vsel %vm1247_vm4, %v1463_v1, 0.0 }
0x21ed   :  { %1255 = vadd.xlane.f32.xlu2 %v1254_v3 }
0x2260   :  { %v1256_v4 = vpop.xlane.xlu2 %1255 }
0x2261   :  { %1464 = vrcp.f32 %v1256_v4 }
0x2267   :  { %v1465_v9 = vpop.eup %1464 }
0x2268   :  { %v1258_v10 = vmul.f32 %v1465_v9, %v1463_v1 }
0x226a   :  { %1259 = vst.msk [vmem:[#allocation5] sm:$0xff] %vm1247_vm4, %v1258_v10 }
0x226b   :  { %1270 = dma.vmem_to_hbm [thread:$0]  %s1266_s27, 128, %s1268_s23, [#allocation4]  }
0x226c   :  { %1517 = dma.done.wait [#allocation4], 128  }
0x226d   :  { %1518 = vsyncadd [#allocation4], 4294967168 }
0x226e   :  { %1275 = vsyncpa [#allocation3], 1 }
0x226f   :  { %1276 = vsyncpa [#allocation4], 1 }

</bundles_post_ra>
